<compile_context>
chip_gen: v5e
topology: v5e:2x2
jax: 0.10.0
libtpu: 0.0.40
codegen_flags: <defaults>
</compile_context>

<pallas_src>
import math

import jax
import jax.numpy as jnp
from jax.experimental import pallas as pl
from jax.experimental.pallas import tpu as pltpu

# ----------------------------- model config ---------------------------------
B = 2            # batch
S = 8            # sequence length
H = 32           # hidden size (scaled down from 768)
NH = 4           # attention heads
DH = H // NH     # head dim
FF = 4 * H       # intermediate size
LAYERS = 2       # scaled down from 12
VOCAB = 50
TYPE_VOCAB = 2
MAX_POS = 16
LAW_CLS = 103
ACCU_CLS = 119
TERM_CLS = 11
N_HEADS_TOTAL = LAW_CLS + ACCU_CLS + TERM_CLS   # 233
HEADS_PAD = 256                                 # lane-dense padded head width
LN_EPS = 1e-12
NHS = NH * S                                    # head-stacked rows per batch elem


# ------------------------------ fused kernel ---------------------------------
def _bert_fused_kernel(emb_ref, bias_ref, eg_ref, eb_ref,
                       wqkv_ref, bqkv_ref, wo_ref, bo_ref, g1_ref, b1_ref,
                       wff1_ref, bff1_ref, wff2_ref, bff2_ref, g2_ref, b2_ref,
                       wh_ref, bh_ref, out_ref):
    """One batch element per grid step; everything stays in VMEM."""
    scale = 1.0 / math.sqrt(DH)

    def layernorm(x, g, b):
        mu = jnp.mean(x, axis=-1, keepdims=True)
        var = jnp.mean(jnp.square(x - mu), axis=-1, keepdims=True)
        return (x - mu) * jax.lax.rsqrt(var + LN_EPS) * g + b

    def gelu_tanh(x):
        # tanh-approximate GELU (runs on the EUP slot).
        c = math.sqrt(2.0 / math.pi)
        return 0.5 * x * (1.0 + jnp.tanh(c * (x + 0.044715 * x * x * x)))

    def stack_heads(x):
        # [S, H] -> [NH*S, DH]; row hh*S + s <- x[s, hh*DH:(hh+1)*DH]
        return jnp.concatenate(
            [x[:, hh * DH:(hh + 1) * DH] for hh in range(NH)], axis=0)

    def unstack_heads(x):
        # [NH*S, DH] -> [S, H]; columns hh*DH:(hh+1)*DH <- rows hh*S:(hh+1)*S
        return jnp.concatenate(
            [x[hh * S:(hh + 1) * S, :] for hh in range(NH)], axis=1)

    emb = emb_ref[0]                       # [S, H]
    attn_bias = bias_ref[0]                # [NH*S, NH*S] additive bias
    h = layernorm(emb, eg_ref[...], eb_ref[...])

    for l in range(LAYERS):
        # --- self attention (fused QKV) ---
        qkv = jnp.dot(h, wqkv_ref[l],
                      preferred_element_type=jnp.float32) + bqkv_ref[l]
        q = qkv[:, 0 * H:1 * H]
        k = qkv[:, 1 * H:2 * H]
        v = qkv[:, 2 * H:3 * H]

        qh = stack_heads(q)                # [NHS, DH]
        kh = stack_heads(k)
        vh = stack_heads(v)

        # single block-diagonal-masked score matmul instead of NH tiny ones
        s = jax.lax.dot_general(qh, kh, (((1,), (1,)), ((), ())),
                                preferred_element_type=jnp.float32)
        s = s * scale + attn_bias          # [NHS, NHS]
        s = s - jnp.max(s, axis=-1, keepdims=True)
        p = jnp.exp(s)
        p = p * pl.reciprocal(jnp.sum(p, axis=-1, keepdims=True), approx=True)

        ctx = unstack_heads(
            jnp.dot(p, vh, preferred_element_type=jnp.float32))   # [S, H]

        attn_out = jnp.dot(ctx, wo_ref[l],
                           preferred_element_type=jnp.float32) + bo_ref[l]
        h = layernorm(attn_out + h, g1_ref[l], b1_ref[l])

        # --- feed forward ---
        ff = jnp.dot(h, wff1_ref[l],
                     preferred_element_type=jnp.float32) + bff1_ref[l]
        ff = gelu_tanh(ff)
        ff = jnp.dot(ff, wff2_ref[l],
                     preferred_element_type=jnp.float32) + bff2_ref[l]
        h = layernorm(ff + h, g2_ref[l], b2_ref[l])

    # --- CLS token + merged classifier heads (padded to 256 lanes) ---
    cls = h[0:1, :]                        # [1, H]
    logits = jnp.dot(cls, wh_ref[...],
                     preferred_element_type=jnp.float32) + bh_ref[...]
    out_ref[0] = logits                    # [1, HEADS_PAD]


def bert_fused_forward(emb, attn_bias, params):
    """emb: [B, S, H]; attn_bias: [B, NHS, NHS]; returns [B, 1, HEADS_PAD]."""
    Bn = emb.shape[0]
    full3 = lambda b: (0, 0, 0)
    full2 = lambda b: (0, 0)
    return pl.pallas_call(
        _bert_fused_kernel,
        out_shape=jax.ShapeDtypeStruct((Bn, 1, HEADS_PAD), jnp.float32),
        grid=(Bn,),
        in_specs=[
            pl.BlockSpec((1, S, H), lambda b: (b, 0, 0)),        # emb
            pl.BlockSpec((1, NHS, NHS), lambda b: (b, 0, 0)),    # attn bias
            pl.BlockSpec((1, H), full2),                         # emb_ln_g
            pl.BlockSpec((1, H), full2),                         # emb_ln_b
            pl.BlockSpec((LAYERS, H, 3 * H), full3),             # wqkv
            pl.BlockSpec((LAYERS, 1, 3 * H), full3),             # bqkv
            pl.BlockSpec((LAYERS, H, H), full3),                 # wo
            pl.BlockSpec((LAYERS, 1, H), full3),                 # bo
            pl.BlockSpec((LAYERS, 1, H), full3),                 # ln1_g
            pl.BlockSpec((LAYERS, 1, H), full3),                 # ln1_b
            pl.BlockSpec((LAYERS, H, FF), full3),                # w_ff1
            pl.BlockSpec((LAYERS, 1, FF), full3),                # b_ff1
            pl.BlockSpec((LAYERS, FF, H), full3),                # w_ff2
            pl.BlockSpec((LAYERS, 1, H), full3),                 # b_ff2
            pl.BlockSpec((LAYERS, 1, H), full3),                 # ln2_g
            pl.BlockSpec((LAYERS, 1, H), full3),                 # ln2_b
            pl.BlockSpec((H, HEADS_PAD), full2),                 # head_w
            pl.BlockSpec((1, HEADS_PAD), full2),                 # head_b
        ],
        out_specs=pl.BlockSpec((1, 1, HEADS_PAD), lambda b: (b, 0, 0)),
        compiler_params=pltpu.CompilerParams(
            dimension_semantics=("parallel",)),
    )(emb, attn_bias,
      params["emb_ln_g"], params["emb_ln_b"],
      params["wqkv"], params["bqkv"], params["wo"], params["bo"],
      params["ln1_g"], params["ln1_b"],
      params["w_ff1"], params["b_ff1"], params["w_ff2"], params["b_ff2"],
      params["ln2_g"], params["ln2_b"],
      params["head_w"], params["head_b"])


# ------------------------------ parameters -----------------------------------
def init_params(key):
    def nrm(k, shape, scale=0.02):
        return scale * jax.random.normal(k, shape, dtype=jnp.float32)

    keys = iter(jax.random.split(key, 32))

    p = {
        "word_emb": nrm(next(keys), (VOCAB, H)),
        "type_emb": nrm(next(keys), (TYPE_VOCAB, H)),
        "pos_emb": nrm(next(keys), (MAX_POS, H)),
        "emb_ln_g": jnp.ones((1, H), jnp.float32),
        "emb_ln_b": jnp.zeros((1, H), jnp.float32),
    }

    wqkv, bqkv, wo, bo, g1, b1 = [], [], [], [], [], []
    wff1, bff1, wff2, bff2, g2, b2 = [], [], [], [], [], []
    for _ in range(LAYERS):
        wq = nrm(next(keys), (H, H))
        wk = nrm(next(keys), (H, H))
        wv = nrm(next(keys), (H, H))
        wqkv.append(jnp.concatenate([wq, wk, wv], axis=1))       # [H, 3H]
        bqkv.append(jnp.zeros((1, 3 * H), jnp.float32))
        wo.append(nrm(next(keys), (H, H)))
        bo.append(jnp.zeros((1, H), jnp.float32))
        g1.append(jnp.ones((1, H), jnp.float32))
        b1.append(jnp.zeros((1, H), jnp.float32))
        wff1.append(nrm(next(keys), (H, FF)))
        bff1.append(jnp.zeros((1, FF), jnp.float32))
        wff2.append(nrm(next(keys), (FF, H)))
        bff2.append(jnp.zeros((1, H), jnp.float32))
        g2.append(jnp.ones((1, H), jnp.float32))
        b2.append(jnp.zeros((1, H), jnp.float32))

    p.update({
        "wqkv": jnp.stack(wqkv), "bqkv": jnp.stack(bqkv),
        "wo": jnp.stack(wo), "bo": jnp.stack(bo),
        "ln1_g": jnp.stack(g1), "ln1_b": jnp.stack(b1),
        "w_ff1": jnp.stack(wff1), "b_ff1": jnp.stack(bff1),
        "w_ff2": jnp.stack(wff2), "b_ff2": jnp.stack(bff2),
        "ln2_g": jnp.stack(g2), "ln2_b": jnp.stack(b2),
    })

    # classifier heads (nn.Linear(768, n) scaled to H), fused + lane-padded.
    cls_w = nrm(next(keys), (H, LAW_CLS))
    accu_w = nrm(next(keys), (H, ACCU_CLS))
    term_w = nrm(next(keys), (H, TERM_CLS))
    head_w = jnp.concatenate([cls_w, accu_w, term_w], axis=1)    # [H, 233]
    head_w = jnp.pad(head_w, ((0, 0), (0, HEADS_PAD - N_HEADS_TOTAL)))
    head_b = jnp.zeros((1, HEADS_PAD), jnp.float32)
    p["head_w"] = head_w
    p["head_b"] = head_b
    return p


# ------------------------------ forward pass ----------------------------------
def bert_legal_finetune_forward(params, input_ids, token_type_ids,
                                attention_mask):
    Bn, Sn = input_ids.shape

    # --- embeddings (gathers are glue in JAX; everything else in Pallas) ---
    word = params["word_emb"][input_ids]                       # [B,S,H]
    typ = params["type_emb"][token_type_ids]                   # [B,S,H]
    pos = params["pos_emb"][jnp.arange(Sn)][None, :, :]        # [1,S,H]
    emb = word + typ + pos                                     # [B,S,H]

    # --- additive attention bias for the head-stacked [NHS, NHS] scores ---
    # In-block (same head) padded keys get -10000 (HF BERT convention);
    # cross-head / cross-block entries get -1e9 so exp underflows to 0 and the
    # merged softmax equals the per-head softmax exactly.
    mask_f = attention_mask.astype(jnp.float32)                # [B,S]
    key_bias = -10000.0 * (1.0 - mask_f)                       # [B,S]
    key_bias = jnp.tile(key_bias, (1, NH))                     # [B,NHS]
    head_id = jnp.arange(NHS) // Sn
    same_head = head_id[:, None] == head_id[None, :]           # [NHS,NHS]
    attn_bias = jnp.where(same_head[None, :, :], key_bias[:, None, :],
                          jnp.float32(-1e9))                   # [B,NHS,NHS]

    # --- single fused Pallas kernel: encoder + CLS + merged heads ---
    # dropout(p=0.1) is identity at inference (eval mode) -> no-op.
    logits_pad = bert_fused_forward(emb, attn_bias, params)    # [B,1,256]
    logits = logits_pad[:, 0, :]                               # [B,256]

    law_logits = logits[:, :LAW_CLS]
    accu_logits = logits[:, LAW_CLS:LAW_CLS + ACCU_CLS]
    term_logits = logits[:, LAW_CLS + ACCU_CLS:N_HEADS_TOTAL]
    return law_logits, accu_logits, term_logits


# ----------------------------------- main -------------------------------------
if __name__ == "__main__":
    key = jax.random.PRNGKey(0)
    k_params, k_ids, k_types = jax.random.split(key, 3)

    params = init_params(k_params)

    input_ids = jax.random.randint(k_ids, (B, S), 0, VOCAB, dtype=jnp.int32)
    token_type_ids = jax.random.randint(k_types, (B, S), 0, TYPE_VOCAB,
                                        dtype=jnp.int32)
    attention_mask = jnp.ones((B, S), dtype=jnp.int32)

    fwd = jax.jit(bert_legal_finetune_forward)
    law, accu, term = fwd(params, input_ids, token_type_ids, attention_mask)
    jax.block_until_ready((law, accu, term))

    assert law.shape == (B, LAW_CLS)
    assert accu.shape == (B, ACCU_CLS)
    assert term.shape == (B, TERM_CLS)
    assert jnp.all(jnp.isfinite(law)) and jnp.all(jnp.isfinite(accu)) \
        and jnp.all(jnp.isfinite(term))
    print("KERNEL_OK")
</pallas_src>

<mosaic_0001>
module attributes {stable_mosaic.version = 11 : i64} {
  func.func @_bert_fused_kernel(%arg0: i32, %arg1: memref<1x8x32xf32, #tpu.memory_space<vmem>>, %arg2: memref<1x32x32xf32, #tpu.memory_space<vmem>>, %arg3: memref<1x32xf32, #tpu.memory_space<vmem>>, %arg4: memref<1x32xf32, #tpu.memory_space<vmem>>, %arg5: memref<2x32x96xf32, #tpu.memory_space<vmem>>, %arg6: memref<2x1x96xf32, #tpu.memory_space<vmem>>, %arg7: memref<2x32x32xf32, #tpu.memory_space<vmem>>, %arg8: memref<2x1x32xf32, #tpu.memory_space<vmem>>, %arg9: memref<2x1x32xf32, #tpu.memory_space<vmem>>, %arg10: memref<2x1x32xf32, #tpu.memory_space<vmem>>, %arg11: memref<2x32x128xf32, #tpu.memory_space<vmem>>, %arg12: memref<2x1x128xf32, #tpu.memory_space<vmem>>, %arg13: memref<2x128x32xf32, #tpu.memory_space<vmem>>, %arg14: memref<2x1x32xf32, #tpu.memory_space<vmem>>, %arg15: memref<2x1x32xf32, #tpu.memory_space<vmem>>, %arg16: memref<2x1x32xf32, #tpu.memory_space<vmem>>, %arg17: memref<32x256xf32, #tpu.memory_space<vmem>>, %arg18: memref<1x256xf32, #tpu.memory_space<vmem>>, %arg19: memref<1x1x256xf32, #tpu.memory_space<vmem>>) attributes {dimension_semantics = [#tpu.dimension_semantics<parallel>], iteration_bounds = array<i64: 2>, scalar_prefetch = 0 : i64, scratch_operands = 0 : i64, tpu.core_type = #tpu.core_type<tc>, window_params = [{transform_indices = @transform_0, window_bounds = array<i64: 1, 8, 32>}, {transform_indices = @transform_1, window_bounds = array<i64: 1, 32, 32>}, {pipeline_mode = #tpu.pipeline_mode<synchronous>, transform_indices = @transform_2, window_bounds = array<i64: 1, 32>}, {pipeline_mode = #tpu.pipeline_mode<synchronous>, transform_indices = @transform_3, window_bounds = array<i64: 1, 32>}, {pipeline_mode = #tpu.pipeline_mode<synchronous>, transform_indices = @transform_4, window_bounds = array<i64: 2, 32, 96>}, {pipeline_mode = #tpu.pipeline_mode<synchronous>, transform_indices = @transform_5, window_bounds = array<i64: 2, 1, 96>}, {pipeline_mode = #tpu.pipeline_mode<synchronous>, transform_indices = @transform_6, window_bounds = array<i64: 2, 32, 32>}, {pipeline_mode = #tpu.pipeline_mode<synchronous>, transform_indices = @transform_7, window_bounds = array<i64: 2, 1, 32>}, {pipeline_mode = #tpu.pipeline_mode<synchronous>, transform_indices = @transform_8, window_bounds = array<i64: 2, 1, 32>}, {pipeline_mode = #tpu.pipeline_mode<synchronous>, transform_indices = @transform_9, window_bounds = array<i64: 2, 1, 32>}, {pipeline_mode = #tpu.pipeline_mode<synchronous>, transform_indices = @transform_10, window_bounds = array<i64: 2, 32, 128>}, {pipeline_mode = #tpu.pipeline_mode<synchronous>, transform_indices = @transform_11, window_bounds = array<i64: 2, 1, 128>}, {pipeline_mode = #tpu.pipeline_mode<synchronous>, transform_indices = @transform_12, window_bounds = array<i64: 2, 128, 32>}, {pipeline_mode = #tpu.pipeline_mode<synchronous>, transform_indices = @transform_13, window_bounds = array<i64: 2, 1, 32>}, {pipeline_mode = #tpu.pipeline_mode<synchronous>, transform_indices = @transform_14, window_bounds = array<i64: 2, 1, 32>}, {pipeline_mode = #tpu.pipeline_mode<synchronous>, transform_indices = @transform_15, window_bounds = array<i64: 2, 1, 32>}, {pipeline_mode = #tpu.pipeline_mode<synchronous>, transform_indices = @transform_16, window_bounds = array<i64: 32, 256>}, {pipeline_mode = #tpu.pipeline_mode<synchronous>, transform_indices = @transform_17, window_bounds = array<i64: 1, 256>}, {transform_indices = @transform_18, window_bounds = array<i64: 1, 1, 256>}]} {
    %c0 = arith.constant 0 : index
    %c0_0 = arith.constant 0 : index
    %c0_1 = arith.constant 0 : index
    %0 = vector.load %arg1[%c0, %c0_0, %c0_1] : memref<1x8x32xf32, #tpu.memory_space<vmem>>, vector<1x8x32xf32>
    %1 = vector.shape_cast %0 : vector<1x8x32xf32> to vector<8x32xf32>
    %c0_2 = arith.constant 0 : index
    %c0_3 = arith.constant 0 : index
    %c0_4 = arith.constant 0 : index
    %2 = vector.load %arg2[%c0_2, %c0_3, %c0_4] : memref<1x32x32xf32, #tpu.memory_space<vmem>>, vector<1x32x32xf32>
    %3 = vector.shape_cast %2 : vector<1x32x32xf32> to vector<32x32xf32>
    %c0_5 = arith.constant 0 : index
    %c0_6 = arith.constant 0 : index
    %4 = vector.load %arg3[%c0_5, %c0_6] : memref<1x32xf32, #tpu.memory_space<vmem>>, vector<1x32xf32>
    %c0_7 = arith.constant 0 : index
    %c0_8 = arith.constant 0 : index
    %5 = vector.load %arg4[%c0_7, %c0_8] : memref<1x32xf32, #tpu.memory_space<vmem>>, vector<1x32xf32>
    %cst = arith.constant dense<0.000000e+00> : vector<8xf32>
    %6 = vector.multi_reduction <add>, %1, %cst [1] : vector<8x32xf32> to vector<8xf32>
    %7 = vector.shape_cast %6 : vector<8xf32> to vector<8x1xf32>
    %cst_9 = arith.constant 3.200000e+01 : f32
    %8 = vector.broadcast %cst_9 : f32 to vector<8x1xf32>
    %9 = arith.divf %7, %8 : vector<8x1xf32>
    %10 = vector.broadcast %9 : vector<8x1xf32> to vector<8x32xf32>
    %11 = arith.subf %1, %10 : vector<8x32xf32>
    %12 = arith.mulf %11, %11 : vector<8x32xf32>
    %cst_10 = arith.constant dense<0.000000e+00> : vector<8xf32>
    %13 = vector.multi_reduction <add>, %12, %cst_10 [1] : vector<8x32xf32> to vector<8xf32>
    %14 = vector.shape_cast %13 : vector<8xf32> to vector<8x1xf32>
    %cst_11 = arith.constant 3.200000e+01 : f32
    %15 = vector.broadcast %cst_11 : f32 to vector<8x1xf32>
    %16 = arith.divf %14, %15 : vector<8x1xf32>
    %17 = vector.broadcast %9 : vector<8x1xf32> to vector<8x32xf32>
    %18 = arith.subf %1, %17 : vector<8x32xf32>
    %cst_12 = arith.constant 9.99999996E-13 : f32
    %19 = vector.broadcast %cst_12 : f32 to vector<8x1xf32>
    %20 = arith.addf %16, %19 : vector<8x1xf32>
    %21 = math.rsqrt %20 : vector<8x1xf32>
    %22 = vector.broadcast %21 : vector<8x1xf32> to vector<8x32xf32>
    %23 = arith.mulf %18, %22 : vector<8x32xf32>
    %24 = vector.broadcast %4 : vector<1x32xf32> to vector<8x32xf32>
    %25 = arith.mulf %23, %24 : vector<8x32xf32>
    %26 = vector.broadcast %5 : vector<1x32xf32> to vector<8x32xf32>
    %27 = arith.addf %25, %26 : vector<8x32xf32>
    %c0_13 = arith.constant 0 : index
    %c0_14 = arith.constant 0 : index
    %c0_15 = arith.constant 0 : index
    %28 = vector.load %arg5[%c0_13, %c0_14, %c0_15] : memref<2x32x96xf32, #tpu.memory_space<vmem>>, vector<1x32x96xf32>
    %29 = vector.shape_cast %28 : vector<1x32x96xf32> to vector<32x96xf32>
    %cst_16 = arith.constant dense<0.000000e+00> : vector<8x96xf32>
    %30 = tpu.matmul %27, %29, %cst_16 {dimension_numbers = #tpu.dot_dimension_numbers<[1], [0], [0], [1], [0, 0, 1, 1], [], []>} : vector<8x32xf32>, vector<32x96xf32>, vector<8x96xf32> -> vector<8x96xf32>
    %c0_17 = arith.constant 0 : index
    %c0_18 = arith.constant 0 : index
    %c0_19 = arith.constant 0 : index
    %31 = vector.load %arg6[%c0_17, %c0_18, %c0_19] : memref<2x1x96xf32, #tpu.memory_space<vmem>>, vector<1x1x96xf32>
    %32 = vector.shape_cast %31 : vector<1x1x96xf32> to vector<1x96xf32>
    %33 = vector.broadcast %32 : vector<1x96xf32> to vector<8x96xf32>
    %34 = arith.addf %30, %33 : vector<8x96xf32>
    %35 = vector.extract_strided_slice %34 {offsets = [0, 0], sizes = [8, 32], strides = [1, 1]} : vector<8x96xf32> to vector<8x32xf32>
    %36 = vector.extract_strided_slice %34 {offsets = [0, 32], sizes = [8, 32], strides = [1, 1]} : vector<8x96xf32> to vector<8x32xf32>
    %37 = vector.extract_strided_slice %34 {offsets = [0, 64], sizes = [8, 32], strides = [1, 1]} : vector<8x96xf32> to vector<8x32xf32>
    %38 = vector.extract_strided_slice %35 {offsets = [0, 0], sizes = [8, 8], strides = [1, 1]} : vector<8x32xf32> to vector<8x8xf32>
    %39 = vector.extract_strided_slice %35 {offsets = [0, 8], sizes = [8, 8], strides = [1, 1]} : vector<8x32xf32> to vector<8x8xf32>
    %40 = vector.extract_strided_slice %35 {offsets = [0, 16], sizes = [8, 8], strides = [1, 1]} : vector<8x32xf32> to vector<8x8xf32>
    %41 = vector.extract_strided_slice %35 {offsets = [0, 24], sizes = [8, 8], strides = [1, 1]} : vector<8x32xf32> to vector<8x8xf32>
    %42 = tpu.concatenate %38, %39, %40, %41 in 0 : vector<8x8xf32>, vector<8x8xf32>, vector<8x8xf32>, vector<8x8xf32> -> vector<32x8xf32>
    %43 = vector.extract_strided_slice %36 {offsets = [0, 0], sizes = [8, 8], strides = [1, 1]} : vector<8x32xf32> to vector<8x8xf32>
    %44 = vector.extract_strided_slice %36 {offsets = [0, 8], sizes = [8, 8], strides = [1, 1]} : vector<8x32xf32> to vector<8x8xf32>
    %45 = vector.extract_strided_slice %36 {offsets = [0, 16], sizes = [8, 8], strides = [1, 1]} : vector<8x32xf32> to vector<8x8xf32>
    %46 = vector.extract_strided_slice %36 {offsets = [0, 24], sizes = [8, 8], strides = [1, 1]} : vector<8x32xf32> to vector<8x8xf32>
    %47 = tpu.concatenate %43, %44, %45, %46 in 0 : vector<8x8xf32>, vector<8x8xf32>, vector<8x8xf32>, vector<8x8xf32> -> vector<32x8xf32>
    %48 = vector.extract_strided_slice %37 {offsets = [0, 0], sizes = [8, 8], strides = [1, 1]} : vector<8x32xf32> to vector<8x8xf32>
    %49 = vector.extract_strided_slice %37 {offsets = [0, 8], sizes = [8, 8], strides = [1, 1]} : vector<8x32xf32> to vector<8x8xf32>
    %50 = vector.extract_strided_slice %37 {offsets = [0, 16], sizes = [8, 8], strides = [1, 1]} : vector<8x32xf32> to vector<8x8xf32>
    %51 = vector.extract_strided_slice %37 {offsets = [0, 24], sizes = [8, 8], strides = [1, 1]} : vector<8x32xf32> to vector<8x8xf32>
    %52 = tpu.concatenate %48, %49, %50, %51 in 0 : vector<8x8xf32>, vector<8x8xf32>, vector<8x8xf32>, vector<8x8xf32> -> vector<32x8xf32>
    %cst_20 = arith.constant dense<0.000000e+00> : vector<32x32xf32>
    %53 = tpu.matmul %42, %47, %cst_20 {dimension_numbers = #tpu.dot_dimension_numbers<[1], [1], [0], [0], [0, 0, 1, 0], [], []>} : vector<32x8xf32>, vector<32x8xf32>, vector<32x32xf32> -> vector<32x32xf32>
    %cst_21 = arith.constant 0.353553385 : f32
    %54 = vector.broadcast %cst_21 : f32 to vector<32x32xf32>
    %55 = arith.mulf %53, %54 : vector<32x32xf32>
    %56 = arith.addf %55, %3 : vector<32x32xf32>
    %cst_22 = arith.constant dense<0xFF800000> : vector<32xf32>
    %57 = vector.multi_reduction <maximumf>, %56, %cst_22 [1] : vector<32x32xf32> to vector<32xf32>
    %58 = vector.shape_cast %57 : vector<32xf32> to vector<32x1xf32>
    %59 = vector.broadcast %58 : vector<32x1xf32> to vector<32x32xf32>
    %60 = arith.subf %56, %59 : vector<32x32xf32>
    %61 = math.exp %60 : vector<32x32xf32>
    %cst_23 = arith.constant dense<0.000000e+00> : vector<32xf32>
    %62 = vector.multi_reduction <add>, %61, %cst_23 [1] : vector<32x32xf32> to vector<32xf32>
    %63 = vector.shape_cast %62 : vector<32xf32> to vector<32x1xf32>
    %64 = tpu.reciprocal %63 {approx = true} : vector<32x1xf32> -> vector<32x1xf32>
    %65 = vector.broadcast %64 : vector<32x1xf32> to vector<32x32xf32>
    %66 = arith.mulf %61, %65 : vector<32x32xf32>
    %cst_24 = arith.constant dense<0.000000e+00> : vector<32x8xf32>
    %67 = tpu.matmul %66, %52, %cst_24 {dimension_numbers = #tpu.dot_dimension_numbers<[1], [0], [0], [1], [0, 0, 1, 1], [], []>} : vector<32x32xf32>, vector<32x8xf32>, vector<32x8xf32> -> vector<32x8xf32>
    %68 = vector.extract_strided_slice %67 {offsets = [0, 0], sizes = [8, 8], strides = [1, 1]} : vector<32x8xf32> to vector<8x8xf32>
    %69 = vector.extract_strided_slice %67 {offsets = [8, 0], sizes = [8, 8], strides = [1, 1]} : vector<32x8xf32> to vector<8x8xf32>
    %70 = vector.extract_strided_slice %67 {offsets = [16, 0], sizes = [8, 8], strides = [1, 1]} : vector<32x8xf32> to vector<8x8xf32>
    %71 = vector.extract_strided_slice %67 {offsets = [24, 0], sizes = [8, 8], strides = [1, 1]} : vector<32x8xf32> to vector<8x8xf32>
    %72 = tpu.concatenate %68, %69, %70, %71 in 1 : vector<8x8xf32>, vector<8x8xf32>, vector<8x8xf32>, vector<8x8xf32> -> vector<8x32xf32>
    %c0_25 = arith.constant 0 : index
    %c0_26 = arith.constant 0 : index
    %c0_27 = arith.constant 0 : index
    %73 = vector.load %arg7[%c0_25, %c0_26, %c0_27] : memref<2x32x32xf32, #tpu.memory_space<vmem>>, vector<1x32x32xf32>
    %74 = vector.shape_cast %73 : vector<1x32x32xf32> to vector<32x32xf32>
    %cst_28 = arith.constant dense<0.000000e+00> : vector<8x32xf32>
    %75 = tpu.matmul %72, %74, %cst_28 {dimension_numbers = #tpu.dot_dimension_numbers<[1], [0], [0], [1], [0, 0, 1, 1], [], []>} : vector<8x32xf32>, vector<32x32xf32>, vector<8x32xf32> -> vector<8x32xf32>
    %c0_29 = arith.constant 0 : index
    %c0_30 = arith.constant 0 : index
    %c0_31 = arith.constant 0 : index
    %76 = vector.load %arg8[%c0_29, %c0_30, %c0_31] : memref<2x1x32xf32, #tpu.memory_space<vmem>>, vector<1x1x32xf32>
    %77 = vector.shape_cast %76 : vector<1x1x32xf32> to vector<1x32xf32>
    %78 = vector.broadcast %77 : vector<1x32xf32> to vector<8x32xf32>
    %79 = arith.addf %75, %78 : vector<8x32xf32>
    %80 = arith.addf %79, %27 : vector<8x32xf32>
    %c0_32 = arith.constant 0 : index
    %c0_33 = arith.constant 0 : index
    %c0_34 = arith.constant 0 : index
    %81 = vector.load %arg9[%c0_32, %c0_33, %c0_34] : memref<2x1x32xf32, #tpu.memory_space<vmem>>, vector<1x1x32xf32>
    %82 = vector.shape_cast %81 : vector<1x1x32xf32> to vector<1x32xf32>
    %c0_35 = arith.constant 0 : index
    %c0_36 = arith.constant 0 : index
    %c0_37 = arith.constant 0 : index
    %83 = vector.load %arg10[%c0_35, %c0_36, %c0_37] : memref<2x1x32xf32, #tpu.memory_space<vmem>>, vector<1x1x32xf32>
    %84 = vector.shape_cast %83 : vector<1x1x32xf32> to vector<1x32xf32>
    %cst_38 = arith.constant dense<0.000000e+00> : vector<8xf32>
    %85 = vector.multi_reduction <add>, %80, %cst_38 [1] : vector<8x32xf32> to vector<8xf32>
    %86 = vector.shape_cast %85 : vector<8xf32> to vector<8x1xf32>
    %cst_39 = arith.constant 3.200000e+01 : f32
    %87 = vector.broadcast %cst_39 : f32 to vector<8x1xf32>
    %88 = arith.divf %86, %87 : vector<8x1xf32>
    %89 = vector.broadcast %88 : vector<8x1xf32> to vector<8x32xf32>
    %90 = arith.subf %80, %89 : vector<8x32xf32>
    %91 = arith.mulf %90, %90 : vector<8x32xf32>
    %cst_40 = arith.constant dense<0.000000e+00> : vector<8xf32>
    %92 = vector.multi_reduction <add>, %91, %cst_40 [1] : vector<8x32xf32> to vector<8xf32>
    %93 = vector.shape_cast %92 : vector<8xf32> to vector<8x1xf32>
    %cst_41 = arith.constant 3.200000e+01 : f32
    %94 = vector.broadcast %cst_41 : f32 to vector<8x1xf32>
    %95 = arith.divf %93, %94 : vector<8x1xf32>
    %96 = vector.broadcast %88 : vector<8x1xf32> to vector<8x32xf32>
    %97 = arith.subf %80, %96 : vector<8x32xf32>
    %cst_42 = arith.constant 9.99999996E-13 : f32
    %98 = vector.broadcast %cst_42 : f32 to vector<8x1xf32>
    %99 = arith.addf %95, %98 : vector<8x1xf32>
    %100 = math.rsqrt %99 : vector<8x1xf32>
    %101 = vector.broadcast %100 : vector<8x1xf32> to vector<8x32xf32>
    %102 = arith.mulf %97, %101 : vector<8x32xf32>
    %103 = vector.broadcast %82 : vector<1x32xf32> to vector<8x32xf32>
    %104 = arith.mulf %102, %103 : vector<8x32xf32>
    %105 = vector.broadcast %84 : vector<1x32xf32> to vector<8x32xf32>
    %106 = arith.addf %104, %105 : vector<8x32xf32>
    %c0_43 = arith.constant 0 : index
    %c0_44 = arith.constant 0 : index
    %c0_45 = arith.constant 0 : index
    %107 = vector.load %arg11[%c0_43, %c0_44, %c0_45] : memref<2x32x128xf32, #tpu.memory_space<vmem>>, vector<1x32x128xf32>
    %108 = vector.shape_cast %107 : vector<1x32x128xf32> to vector<32x128xf32>
    %cst_46 = arith.constant dense<0.000000e+00> : vector<8x128xf32>
    %109 = tpu.matmul %106, %108, %cst_46 {dimension_numbers = #tpu.dot_dimension_numbers<[1], [0], [0], [1], [0, 0, 1, 1], [], []>} : vector<8x32xf32>, vector<32x128xf32>, vector<8x128xf32> -> vector<8x128xf32>
    %c0_47 = arith.constant 0 : index
    %c0_48 = arith.constant 0 : index
    %c0_49 = arith.constant 0 : index
    %110 = vector.load %arg12[%c0_47, %c0_48, %c0_49] : memref<2x1x128xf32, #tpu.memory_space<vmem>>, vector<1x1x128xf32>
    %111 = vector.shape_cast %110 : vector<1x1x128xf32> to vector<1x128xf32>
    %112 = vector.broadcast %111 : vector<1x128xf32> to vector<8x128xf32>
    %113 = arith.addf %109, %112 : vector<8x128xf32>
    %cst_50 = arith.constant 5.000000e-01 : f32
    %114 = vector.broadcast %cst_50 : f32 to vector<8x128xf32>
    %115 = arith.mulf %114, %113 : vector<8x128xf32>
    %cst_51 = arith.constant 4.471500e-02 : f32
    %116 = vector.broadcast %cst_51 : f32 to vector<8x128xf32>
    %117 = arith.mulf %116, %113 : vector<8x128xf32>
    %118 = arith.mulf %117, %113 : vector<8x128xf32>
    %119 = arith.mulf %118, %113 : vector<8x128xf32>
    %120 = arith.addf %113, %119 : vector<8x128xf32>
    %cst_52 = arith.constant 0.797884583 : f32
    %121 = vector.broadcast %cst_52 : f32 to vector<8x128xf32>
    %122 = arith.mulf %121, %120 : vector<8x128xf32>
    %123 = math.tanh %122 : vector<8x128xf32>
    %cst_53 = arith.constant 1.000000e+00 : f32
    %124 = vector.broadcast %cst_53 : f32 to vector<8x128xf32>
    %125 = arith.addf %124, %123 : vector<8x128xf32>
    %126 = arith.mulf %115, %125 : vector<8x128xf32>
    %c0_54 = arith.constant 0 : index
    %c0_55 = arith.constant 0 : index
    %c0_56 = arith.constant 0 : index
    %127 = vector.load %arg13[%c0_54, %c0_55, %c0_56] : memref<2x128x32xf32, #tpu.memory_space<vmem>>, vector<1x128x32xf32>
    %128 = vector.shape_cast %127 : vector<1x128x32xf32> to vector<128x32xf32>
    %cst_57 = arith.constant dense<0.000000e+00> : vector<8x32xf32>
    %129 = tpu.matmul %126, %128, %cst_57 {dimension_numbers = #tpu.dot_dimension_numbers<[1], [0], [0], [1], [0, 0, 1, 1], [], []>} : vector<8x128xf32>, vector<128x32xf32>, vector<8x32xf32> -> vector<8x32xf32>
    %c0_58 = arith.constant 0 : index
    %c0_59 = arith.constant 0 : index
    %c0_60 = arith.constant 0 : index
    %130 = vector.load %arg14[%c0_58, %c0_59, %c0_60] : memref<2x1x32xf32, #tpu.memory_space<vmem>>, vector<1x1x32xf32>
    %131 = vector.shape_cast %130 : vector<1x1x32xf32> to vector<1x32xf32>
    %132 = vector.broadcast %131 : vector<1x32xf32> to vector<8x32xf32>
    %133 = arith.addf %129, %132 : vector<8x32xf32>
    %134 = arith.addf %133, %106 : vector<8x32xf32>
    %c0_61 = arith.constant 0 : index
    %c0_62 = arith.constant 0 : index
    %c0_63 = arith.constant 0 : index
    %135 = vector.load %arg15[%c0_61, %c0_62, %c0_63] : memref<2x1x32xf32, #tpu.memory_space<vmem>>, vector<1x1x32xf32>
    %136 = vector.shape_cast %135 : vector<1x1x32xf32> to vector<1x32xf32>
    %c0_64 = arith.constant 0 : index
    %c0_65 = arith.constant 0 : index
    %c0_66 = arith.constant 0 : index
    %137 = vector.load %arg16[%c0_64, %c0_65, %c0_66] : memref<2x1x32xf32, #tpu.memory_space<vmem>>, vector<1x1x32xf32>
    %138 = vector.shape_cast %137 : vector<1x1x32xf32> to vector<1x32xf32>
    %cst_67 = arith.constant dense<0.000000e+00> : vector<8xf32>
    %139 = vector.multi_reduction <add>, %134, %cst_67 [1] : vector<8x32xf32> to vector<8xf32>
    %140 = vector.shape_cast %139 : vector<8xf32> to vector<8x1xf32>
    %cst_68 = arith.constant 3.200000e+01 : f32
    %141 = vector.broadcast %cst_68 : f32 to vector<8x1xf32>
    %142 = arith.divf %140, %141 : vector<8x1xf32>
    %143 = vector.broadcast %142 : vector<8x1xf32> to vector<8x32xf32>
    %144 = arith.subf %134, %143 : vector<8x32xf32>
    %145 = arith.mulf %144, %144 : vector<8x32xf32>
    %cst_69 = arith.constant dense<0.000000e+00> : vector<8xf32>
    %146 = vector.multi_reduction <add>, %145, %cst_69 [1] : vector<8x32xf32> to vector<8xf32>
    %147 = vector.shape_cast %146 : vector<8xf32> to vector<8x1xf32>
    %cst_70 = arith.constant 3.200000e+01 : f32
    %148 = vector.broadcast %cst_70 : f32 to vector<8x1xf32>
    %149 = arith.divf %147, %148 : vector<8x1xf32>
    %150 = vector.broadcast %142 : vector<8x1xf32> to vector<8x32xf32>
    %151 = arith.subf %134, %150 : vector<8x32xf32>
    %cst_71 = arith.constant 9.99999996E-13 : f32
    %152 = vector.broadcast %cst_71 : f32 to vector<8x1xf32>
    %153 = arith.addf %149, %152 : vector<8x1xf32>
    %154 = math.rsqrt %153 : vector<8x1xf32>
    %155 = vector.broadcast %154 : vector<8x1xf32> to vector<8x32xf32>
    %156 = arith.mulf %151, %155 : vector<8x32xf32>
    %157 = vector.broadcast %136 : vector<1x32xf32> to vector<8x32xf32>
    %158 = arith.mulf %156, %157 : vector<8x32xf32>
    %159 = vector.broadcast %138 : vector<1x32xf32> to vector<8x32xf32>
    %160 = arith.addf %158, %159 : vector<8x32xf32>
    %c1 = arith.constant 1 : index
    %c0_72 = arith.constant 0 : index
    %c0_73 = arith.constant 0 : index
    %161 = vector.load %arg5[%c1, %c0_72, %c0_73] : memref<2x32x96xf32, #tpu.memory_space<vmem>>, vector<1x32x96xf32>
    %162 = vector.shape_cast %161 : vector<1x32x96xf32> to vector<32x96xf32>
    %cst_74 = arith.constant dense<0.000000e+00> : vector<8x96xf32>
    %163 = tpu.matmul %160, %162, %cst_74 {dimension_numbers = #tpu.dot_dimension_numbers<[1], [0], [0], [1], [0, 0, 1, 1], [], []>} : vector<8x32xf32>, vector<32x96xf32>, vector<8x96xf32> -> vector<8x96xf32>
    %c1_75 = arith.constant 1 : index
    %c0_76 = arith.constant 0 : index
    %c0_77 = arith.constant 0 : index
    %164 = vector.load %arg6[%c1_75, %c0_76, %c0_77] : memref<2x1x96xf32, #tpu.memory_space<vmem>>, vector<1x1x96xf32>
    %165 = vector.shape_cast %164 : vector<1x1x96xf32> to vector<1x96xf32>
    %166 = vector.broadcast %165 : vector<1x96xf32> to vector<8x96xf32>
    %167 = arith.addf %163, %166 : vector<8x96xf32>
    %168 = vector.extract_strided_slice %167 {offsets = [0, 0], sizes = [8, 32], strides = [1, 1]} : vector<8x96xf32> to vector<8x32xf32>
    %169 = vector.extract_strided_slice %167 {offsets = [0, 32], sizes = [8, 32], strides = [1, 1]} : vector<8x96xf32> to vector<8x32xf32>
    %170 = vector.extract_strided_slice %167 {offsets = [0, 64], sizes = [8, 32], strides = [1, 1]} : vector<8x96xf32> to vector<8x32xf32>
    %171 = vector.extract_strided_slice %168 {offsets = [0, 0], sizes = [8, 8], strides = [1, 1]} : vector<8x32xf32> to vector<8x8xf32>
    %172 = vector.extract_strided_slice %168 {offsets = [0, 8], sizes = [8, 8], strides = [1, 1]} : vector<8x32xf32> to vector<8x8xf32>
    %173 = vector.extract_strided_slice %168 {offsets = [0, 16], sizes = [8, 8], strides = [1, 1]} : vector<8x32xf32> to vector<8x8xf32>
    %174 = vector.extract_strided_slice %168 {offsets = [0, 24], sizes = [8, 8], strides = [1, 1]} : vector<8x32xf32> to vector<8x8xf32>
    %175 = tpu.concatenate %171, %172, %173, %174 in 0 : vector<8x8xf32>, vector<8x8xf32>, vector<8x8xf32>, vector<8x8xf32> -> vector<32x8xf32>
    %176 = vector.extract_strided_slice %169 {offsets = [0, 0], sizes = [8, 8], strides = [1, 1]} : vector<8x32xf32> to vector<8x8xf32>
    %177 = vector.extract_strided_slice %169 {offsets = [0, 8], sizes = [8, 8], strides = [1, 1]} : vector<8x32xf32> to vector<8x8xf32>
    %178 = vector.extract_strided_slice %169 {offsets = [0, 16], sizes = [8, 8], strides = [1, 1]} : vector<8x32xf32> to vector<8x8xf32>
    %179 = vector.extract_strided_slice %169 {offsets = [0, 24], sizes = [8, 8], strides = [1, 1]} : vector<8x32xf32> to vector<8x8xf32>
    %180 = tpu.concatenate %176, %177, %178, %179 in 0 : vector<8x8xf32>, vector<8x8xf32>, vector<8x8xf32>, vector<8x8xf32> -> vector<32x8xf32>
    %181 = vector.extract_strided_slice %170 {offsets = [0, 0], sizes = [8, 8], strides = [1, 1]} : vector<8x32xf32> to vector<8x8xf32>
    %182 = vector.extract_strided_slice %170 {offsets = [0, 8], sizes = [8, 8], strides = [1, 1]} : vector<8x32xf32> to vector<8x8xf32>
    %183 = vector.extract_strided_slice %170 {offsets = [0, 16], sizes = [8, 8], strides = [1, 1]} : vector<8x32xf32> to vector<8x8xf32>
    %184 = vector.extract_strided_slice %170 {offsets = [0, 24], sizes = [8, 8], strides = [1, 1]} : vector<8x32xf32> to vector<8x8xf32>
    %185 = tpu.concatenate %181, %182, %183, %184 in 0 : vector<8x8xf32>, vector<8x8xf32>, vector<8x8xf32>, vector<8x8xf32> -> vector<32x8xf32>
    %cst_78 = arith.constant dense<0.000000e+00> : vector<32x32xf32>
    %186 = tpu.matmul %175, %180, %cst_78 {dimension_numbers = #tpu.dot_dimension_numbers<[1], [1], [0], [0], [0, 0, 1, 0], [], []>} : vector<32x8xf32>, vector<32x8xf32>, vector<32x32xf32> -> vector<32x32xf32>
    %cst_79 = arith.constant 0.353553385 : f32
    %187 = vector.broadcast %cst_79 : f32 to vector<32x32xf32>
    %188 = arith.mulf %186, %187 : vector<32x32xf32>
    %189 = arith.addf %188, %3 : vector<32x32xf32>
    %cst_80 = arith.constant dense<0xFF800000> : vector<32xf32>
    %190 = vector.multi_reduction <maximumf>, %189, %cst_80 [1] : vector<32x32xf32> to vector<32xf32>
    %191 = vector.shape_cast %190 : vector<32xf32> to vector<32x1xf32>
    %192 = vector.broadcast %191 : vector<32x1xf32> to vector<32x32xf32>
    %193 = arith.subf %189, %192 : vector<32x32xf32>
    %194 = math.exp %193 : vector<32x32xf32>
    %cst_81 = arith.constant dense<0.000000e+00> : vector<32xf32>
    %195 = vector.multi_reduction <add>, %194, %cst_81 [1] : vector<32x32xf32> to vector<32xf32>
    %196 = vector.shape_cast %195 : vector<32xf32> to vector<32x1xf32>
    %197 = tpu.reciprocal %196 {approx = true} : vector<32x1xf32> -> vector<32x1xf32>
    %198 = vector.broadcast %197 : vector<32x1xf32> to vector<32x32xf32>
    %199 = arith.mulf %194, %198 : vector<32x32xf32>
    %cst_82 = arith.constant dense<0.000000e+00> : vector<32x8xf32>
    %200 = tpu.matmul %199, %185, %cst_82 {dimension_numbers = #tpu.dot_dimension_numbers<[1], [0], [0], [1], [0, 0, 1, 1], [], []>} : vector<32x32xf32>, vector<32x8xf32>, vector<32x8xf32> -> vector<32x8xf32>
    %201 = vector.extract_strided_slice %200 {offsets = [0, 0], sizes = [8, 8], strides = [1, 1]} : vector<32x8xf32> to vector<8x8xf32>
    %202 = vector.extract_strided_slice %200 {offsets = [8, 0], sizes = [8, 8], strides = [1, 1]} : vector<32x8xf32> to vector<8x8xf32>
    %203 = vector.extract_strided_slice %200 {offsets = [16, 0], sizes = [8, 8], strides = [1, 1]} : vector<32x8xf32> to vector<8x8xf32>
    %204 = vector.extract_strided_slice %200 {offsets = [24, 0], sizes = [8, 8], strides = [1, 1]} : vector<32x8xf32> to vector<8x8xf32>
    %205 = tpu.concatenate %201, %202, %203, %204 in 1 : vector<8x8xf32>, vector<8x8xf32>, vector<8x8xf32>, vector<8x8xf32> -> vector<8x32xf32>
    %c1_83 = arith.constant 1 : index
    %c0_84 = arith.constant 0 : index
    %c0_85 = arith.constant 0 : index
    %206 = vector.load %arg7[%c1_83, %c0_84, %c0_85] : memref<2x32x32xf32, #tpu.memory_space<vmem>>, vector<1x32x32xf32>
    %207 = vector.shape_cast %206 : vector<1x32x32xf32> to vector<32x32xf32>
    %cst_86 = arith.constant dense<0.000000e+00> : vector<8x32xf32>
    %208 = tpu.matmul %205, %207, %cst_86 {dimension_numbers = #tpu.dot_dimension_numbers<[1], [0], [0], [1], [0, 0, 1, 1], [], []>} : vector<8x32xf32>, vector<32x32xf32>, vector<8x32xf32> -> vector<8x32xf32>
    %c1_87 = arith.constant 1 : index
    %c0_88 = arith.constant 0 : index
    %c0_89 = arith.constant 0 : index
    %209 = vector.load %arg8[%c1_87, %c0_88, %c0_89] : memref<2x1x32xf32, #tpu.memory_space<vmem>>, vector<1x1x32xf32>
    %210 = vector.shape_cast %209 : vector<1x1x32xf32> to vector<1x32xf32>
    %211 = vector.broadcast %210 : vector<1x32xf32> to vector<8x32xf32>
    %212 = arith.addf %208, %211 : vector<8x32xf32>
    %213 = arith.addf %212, %160 : vector<8x32xf32>
    %c1_90 = arith.constant 1 : index
    %c0_91 = arith.constant 0 : index
    %c0_92 = arith.constant 0 : index
    %214 = vector.load %arg9[%c1_90, %c0_91, %c0_92] : memref<2x1x32xf32, #tpu.memory_space<vmem>>, vector<1x1x32xf32>
    %215 = vector.shape_cast %214 : vector<1x1x32xf32> to vector<1x32xf32>
    %c1_93 = arith.constant 1 : index
    %c0_94 = arith.constant 0 : index
    %c0_95 = arith.constant 0 : index
    %216 = vector.load %arg10[%c1_93, %c0_94, %c0_95] : memref<2x1x32xf32, #tpu.memory_space<vmem>>, vector<1x1x32xf32>
    %217 = vector.shape_cast %216 : vector<1x1x32xf32> to vector<1x32xf32>
    %cst_96 = arith.constant dense<0.000000e+00> : vector<8xf32>
    %218 = vector.multi_reduction <add>, %213, %cst_96 [1] : vector<8x32xf32> to vector<8xf32>
    %219 = vector.shape_cast %218 : vector<8xf32> to vector<8x1xf32>
    %cst_97 = arith.constant 3.200000e+01 : f32
    %220 = vector.broadcast %cst_97 : f32 to vector<8x1xf32>
    %221 = arith.divf %219, %220 : vector<8x1xf32>
    %222 = vector.broadcast %221 : vector<8x1xf32> to vector<8x32xf32>
    %223 = arith.subf %213, %222 : vector<8x32xf32>
    %224 = arith.mulf %223, %223 : vector<8x32xf32>
    %cst_98 = arith.constant dense<0.000000e+00> : vector<8xf32>
    %225 = vector.multi_reduction <add>, %224, %cst_98 [1] : vector<8x32xf32> to vector<8xf32>
    %226 = vector.shape_cast %225 : vector<8xf32> to vector<8x1xf32>
    %cst_99 = arith.constant 3.200000e+01 : f32
    %227 = vector.broadcast %cst_99 : f32 to vector<8x1xf32>
    %228 = arith.divf %226, %227 : vector<8x1xf32>
    %229 = vector.broadcast %221 : vector<8x1xf32> to vector<8x32xf32>
    %230 = arith.subf %213, %229 : vector<8x32xf32>
    %cst_100 = arith.constant 9.99999996E-13 : f32
    %231 = vector.broadcast %cst_100 : f32 to vector<8x1xf32>
    %232 = arith.addf %228, %231 : vector<8x1xf32>
    %233 = math.rsqrt %232 : vector<8x1xf32>
    %234 = vector.broadcast %233 : vector<8x1xf32> to vector<8x32xf32>
    %235 = arith.mulf %230, %234 : vector<8x32xf32>
    %236 = vector.broadcast %215 : vector<1x32xf32> to vector<8x32xf32>
    %237 = arith.mulf %235, %236 : vector<8x32xf32>
    %238 = vector.broadcast %217 : vector<1x32xf32> to vector<8x32xf32>
    %239 = arith.addf %237, %238 : vector<8x32xf32>
    %c1_101 = arith.constant 1 : index
    %c0_102 = arith.constant 0 : index
    %c0_103 = arith.constant 0 : index
    %240 = vector.load %arg11[%c1_101, %c0_102, %c0_103] : memref<2x32x128xf32, #tpu.memory_space<vmem>>, vector<1x32x128xf32>
    %241 = vector.shape_cast %240 : vector<1x32x128xf32> to vector<32x128xf32>
    %cst_104 = arith.constant dense<0.000000e+00> : vector<8x128xf32>
    %242 = tpu.matmul %239, %241, %cst_104 {dimension_numbers = #tpu.dot_dimension_numbers<[1], [0], [0], [1], [0, 0, 1, 1], [], []>} : vector<8x32xf32>, vector<32x128xf32>, vector<8x128xf32> -> vector<8x128xf32>
    %c1_105 = arith.constant 1 : index
    %c0_106 = arith.constant 0 : index
    %c0_107 = arith.constant 0 : index
    %243 = vector.load %arg12[%c1_105, %c0_106, %c0_107] : memref<2x1x128xf32, #tpu.memory_space<vmem>>, vector<1x1x128xf32>
    %244 = vector.shape_cast %243 : vector<1x1x128xf32> to vector<1x128xf32>
    %245 = vector.broadcast %244 : vector<1x128xf32> to vector<8x128xf32>
    %246 = arith.addf %242, %245 : vector<8x128xf32>
    %cst_108 = arith.constant 5.000000e-01 : f32
    %247 = vector.broadcast %cst_108 : f32 to vector<8x128xf32>
    %248 = arith.mulf %247, %246 : vector<8x128xf32>
    %cst_109 = arith.constant 4.471500e-02 : f32
    %249 = vector.broadcast %cst_109 : f32 to vector<8x128xf32>
    %250 = arith.mulf %249, %246 : vector<8x128xf32>
    %251 = arith.mulf %250, %246 : vector<8x128xf32>
    %252 = arith.mulf %251, %246 : vector<8x128xf32>
    %253 = arith.addf %246, %252 : vector<8x128xf32>
    %cst_110 = arith.constant 0.797884583 : f32
    %254 = vector.broadcast %cst_110 : f32 to vector<8x128xf32>
    %255 = arith.mulf %254, %253 : vector<8x128xf32>
    %256 = math.tanh %255 : vector<8x128xf32>
    %cst_111 = arith.constant 1.000000e+00 : f32
    %257 = vector.broadcast %cst_111 : f32 to vector<8x128xf32>
    %258 = arith.addf %257, %256 : vector<8x128xf32>
    %259 = arith.mulf %248, %258 : vector<8x128xf32>
    %c1_112 = arith.constant 1 : index
    %c0_113 = arith.constant 0 : index
    %c0_114 = arith.constant 0 : index
    %260 = vector.load %arg13[%c1_112, %c0_113, %c0_114] : memref<2x128x32xf32, #tpu.memory_space<vmem>>, vector<1x128x32xf32>
    %261 = vector.shape_cast %260 : vector<1x128x32xf32> to vector<128x32xf32>
    %cst_115 = arith.constant dense<0.000000e+00> : vector<8x32xf32>
    %262 = tpu.matmul %259, %261, %cst_115 {dimension_numbers = #tpu.dot_dimension_numbers<[1], [0], [0], [1], [0, 0, 1, 1], [], []>} : vector<8x128xf32>, vector<128x32xf32>, vector<8x32xf32> -> vector<8x32xf32>
    %c1_116 = arith.constant 1 : index
    %c0_117 = arith.constant 0 : index
    %c0_118 = arith.constant 0 : index
    %263 = vector.load %arg14[%c1_116, %c0_117, %c0_118] : memref<2x1x32xf32, #tpu.memory_space<vmem>>, vector<1x1x32xf32>
    %264 = vector.shape_cast %263 : vector<1x1x32xf32> to vector<1x32xf32>
    %265 = vector.broadcast %264 : vector<1x32xf32> to vector<8x32xf32>
    %266 = arith.addf %262, %265 : vector<8x32xf32>
    %267 = arith.addf %266, %239 : vector<8x32xf32>
    %c1_119 = arith.constant 1 : index
    %c0_120 = arith.constant 0 : index
    %c0_121 = arith.constant 0 : index
    %268 = vector.load %arg15[%c1_119, %c0_120, %c0_121] : memref<2x1x32xf32, #tpu.memory_space<vmem>>, vector<1x1x32xf32>
    %269 = vector.shape_cast %268 : vector<1x1x32xf32> to vector<1x32xf32>
    %c1_122 = arith.constant 1 : index
    %c0_123 = arith.constant 0 : index
    %c0_124 = arith.constant 0 : index
    %270 = vector.load %arg16[%c1_122, %c0_123, %c0_124] : memref<2x1x32xf32, #tpu.memory_space<vmem>>, vector<1x1x32xf32>
    %271 = vector.shape_cast %270 : vector<1x1x32xf32> to vector<1x32xf32>
    %cst_125 = arith.constant dense<0.000000e+00> : vector<8xf32>
    %272 = vector.multi_reduction <add>, %267, %cst_125 [1] : vector<8x32xf32> to vector<8xf32>
    %273 = vector.shape_cast %272 : vector<8xf32> to vector<8x1xf32>
    %cst_126 = arith.constant 3.200000e+01 : f32
    %274 = vector.broadcast %cst_126 : f32 to vector<8x1xf32>
    %275 = arith.divf %273, %274 : vector<8x1xf32>
    %276 = vector.broadcast %275 : vector<8x1xf32> to vector<8x32xf32>
    %277 = arith.subf %267, %276 : vector<8x32xf32>
    %278 = arith.mulf %277, %277 : vector<8x32xf32>
    %cst_127 = arith.constant dense<0.000000e+00> : vector<8xf32>
    %279 = vector.multi_reduction <add>, %278, %cst_127 [1] : vector<8x32xf32> to vector<8xf32>
    %280 = vector.shape_cast %279 : vector<8xf32> to vector<8x1xf32>
    %cst_128 = arith.constant 3.200000e+01 : f32
    %281 = vector.broadcast %cst_128 : f32 to vector<8x1xf32>
    %282 = arith.divf %280, %281 : vector<8x1xf32>
    %283 = vector.broadcast %275 : vector<8x1xf32> to vector<8x32xf32>
    %284 = arith.subf %267, %283 : vector<8x32xf32>
    %cst_129 = arith.constant 9.99999996E-13 : f32
    %285 = vector.broadcast %cst_129 : f32 to vector<8x1xf32>
    %286 = arith.addf %282, %285 : vector<8x1xf32>
    %287 = math.rsqrt %286 : vector<8x1xf32>
    %288 = vector.broadcast %287 : vector<8x1xf32> to vector<8x32xf32>
    %289 = arith.mulf %284, %288 : vector<8x32xf32>
    %290 = vector.broadcast %269 : vector<1x32xf32> to vector<8x32xf32>
    %291 = arith.mulf %289, %290 : vector<8x32xf32>
    %292 = vector.broadcast %271 : vector<1x32xf32> to vector<8x32xf32>
    %293 = arith.addf %291, %292 : vector<8x32xf32>
    %294 = vector.extract_strided_slice %293 {offsets = [0, 0], sizes = [1, 32], strides = [1, 1]} : vector<8x32xf32> to vector<1x32xf32>
    %c0_130 = arith.constant 0 : index
    %c0_131 = arith.constant 0 : index
    %295 = vector.load %arg17[%c0_130, %c0_131] : memref<32x256xf32, #tpu.memory_space<vmem>>, vector<32x256xf32>
    %cst_132 = arith.constant dense<0.000000e+00> : vector<1x256xf32>
    %296 = tpu.matmul %294, %295, %cst_132 {dimension_numbers = #tpu.dot_dimension_numbers<[1], [0], [0], [1], [0, 0, 1, 1], [], []>} : vector<1x32xf32>, vector<32x256xf32>, vector<1x256xf32> -> vector<1x256xf32>
    %c0_133 = arith.constant 0 : index
    %c0_134 = arith.constant 0 : index
    %297 = vector.load %arg18[%c0_133, %c0_134] : memref<1x256xf32, #tpu.memory_space<vmem>>, vector<1x256xf32>
    %298 = arith.addf %296, %297 : vector<1x256xf32>
    %c0_135 = arith.constant 0 : index
    %c0_136 = arith.constant 0 : index
    %c0_137 = arith.constant 0 : index
    %299 = vector.load %arg19[%c0_135, %c0_136, %c0_137] : memref<1x1x256xf32, #tpu.memory_space<vmem>>, vector<1x1x256xf32>
    %300 = vector.shape_cast %299 : vector<1x1x256xf32> to vector<1x256xf32>
    %301 = vector.shape_cast %298 : vector<1x256xf32> to vector<1x1x256xf32>
    tpu.vector_store %arg19[%c0_135, %c0_136, %c0_137], %301 {strides = array<i32>} : memref<1x1x256xf32, #tpu.memory_space<vmem>>, vector<1x1x256xf32>,
    return
  }
  func.func @transform_0(%arg0: i32) -> (i32, i32, i32) {
    %c0_i32 = arith.constant 0 : i32
    %c0_i32_0 = arith.constant 0 : i32
    %c0_i32_1 = arith.constant 0 : i32
    return %arg0, %c0_i32, %c0_i32_0 : i32, i32, i32
  }
  func.func @transform_1(%arg0: i32) -> (i32, i32, i32) {
    %c0_i32 = arith.constant 0 : i32
    %c0_i32_0 = arith.constant 0 : i32
    %c0_i32_1 = arith.constant 0 : i32
    return %arg0, %c0_i32, %c0_i32_0 : i32, i32, i32
  }
  func.func @transform_2(%arg0: i32) -> (i32, i32) {
    %c0_i32 = arith.constant 0 : i32
    %c0_i32_0 = arith.constant 0 : i32
    %c0_i32_1 = arith.constant 0 : i32
    return %c0_i32, %c0_i32_0 : i32, i32
  }
  func.func @transform_3(%arg0: i32) -> (i32, i32) {
    %c0_i32 = arith.constant 0 : i32
    %c0_i32_0 = arith.constant 0 : i32
    %c0_i32_1 = arith.constant 0 : i32
    return %c0_i32, %c0_i32_0 : i32, i32
  }
  func.func @transform_4(%arg0: i32) -> (i32, i32, i32) {
    %c0_i32 = arith.constant 0 : i32
    %c0_i32_0 = arith.constant 0 : i32
    %c0_i32_1 = arith.constant 0 : i32
    %c0_i32_2 = arith.constant 0 : i32
    return %c0_i32, %c0_i32_0, %c0_i32_1 : i32, i32, i32
  }
  func.func @transform_5(%arg0: i32) -> (i32, i32, i32) {
    %c0_i32 = arith.constant 0 : i32
    %c0_i32_0 = arith.constant 0 : i32
    %c0_i32_1 = arith.constant 0 : i32
    %c0_i32_2 = arith.constant 0 : i32
    return %c0_i32, %c0_i32_0, %c0_i32_1 : i32, i32, i32
  }
  func.func @transform_6(%arg0: i32) -> (i32, i32, i32) {
    %c0_i32 = arith.constant 0 : i32
    %c0_i32_0 = arith.constant 0 : i32
    %c0_i32_1 = arith.constant 0 : i32
    %c0_i32_2 = arith.constant 0 : i32
    return %c0_i32, %c0_i32_0, %c0_i32_1 : i32, i32, i32
  }
  func.func @transform_7(%arg0: i32) -> (i32, i32, i32) {
    %c0_i32 = arith.constant 0 : i32
    %c0_i32_0 = arith.constant 0 : i32
    %c0_i32_1 = arith.constant 0 : i32
    %c0_i32_2 = arith.constant 0 : i32
    return %c0_i32, %c0_i32_0, %c0_i32_1 : i32, i32, i32
  }
  func.func @transform_8(%arg0: i32) -> (i32, i32, i32) {
    %c0_i32 = arith.constant 0 : i32
    %c0_i32_0 = arith.constant 0 : i32
    %c0_i32_1 = arith.constant 0 : i32
    %c0_i32_2 = arith.constant 0 : i32
    return %c0_i32, %c0_i32_0, %c0_i32_1 : i32, i32, i32
  }
  func.func @transform_9(%arg0: i32) -> (i32, i32, i32) {
    %c0_i32 = arith.constant 0 : i32
    %c0_i32_0 = arith.constant 0 : i32
    %c0_i32_1 = arith.constant 0 : i32
    %c0_i32_2 = arith.constant 0 : i32
    return %c0_i32, %c0_i32_0, %c0_i32_1 : i32, i32, i32
  }
  func.func @transform_10(%arg0: i32) -> (i32, i32, i32) {
    %c0_i32 = arith.constant 0 : i32
    %c0_i32_0 = arith.constant 0 : i32
    %c0_i32_1 = arith.constant 0 : i32
    %c0_i32_2 = arith.constant 0 : i32
    return %c0_i32, %c0_i32_0, %c0_i32_1 : i32, i32, i32
  }
  func.func @transform_11(%arg0: i32) -> (i32, i32, i32) {
    %c0_i32 = arith.constant 0 : i32
    %c0_i32_0 = arith.constant 0 : i32
    %c0_i32_1 = arith.constant 0 : i32
    %c0_i32_2 = arith.constant 0 : i32
    return %c0_i32, %c0_i32_0, %c0_i32_1 : i32, i32, i32
  }
  func.func @transform_12(%arg0: i32) -> (i32, i32, i32) {
    %c0_i32 = arith.constant 0 : i32
    %c0_i32_0 = arith.constant 0 : i32
    %c0_i32_1 = arith.constant 0 : i32
    %c0_i32_2 = arith.constant 0 : i32
    return %c0_i32, %c0_i32_0, %c0_i32_1 : i32, i32, i32
  }
  func.func @transform_13(%arg0: i32) -> (i32, i32, i32) {
    %c0_i32 = arith.constant 0 : i32
    %c0_i32_0 = arith.constant 0 : i32
    %c0_i32_1 = arith.constant 0 : i32
    %c0_i32_2 = arith.constant 0 : i32
    return %c0_i32, %c0_i32_0, %c0_i32_1 : i32, i32, i32
  }
  func.func @transform_14(%arg0: i32) -> (i32, i32, i32) {
    %c0_i32 = arith.constant 0 : i32
    %c0_i32_0 = arith.constant 0 : i32
    %c0_i32_1 = arith.constant 0 : i32
    %c0_i32_2 = arith.constant 0 : i32
    return %c0_i32, %c0_i32_0, %c0_i32_1 : i32, i32, i32
  }
  func.func @transform_15(%arg0: i32) -> (i32, i32, i32) {
    %c0_i32 = arith.constant 0 : i32
    %c0_i32_0 = arith.constant 0 : i32
    %c0_i32_1 = arith.constant 0 : i32
    %c0_i32_2 = arith.constant 0 : i32
    return %c0_i32, %c0_i32_0, %c0_i32_1 : i32, i32, i32
  }
  func.func @transform_16(%arg0: i32) -> (i32, i32) {
    %c0_i32 = arith.constant 0 : i32
    %c0_i32_0 = arith.constant 0 : i32
    %c0_i32_1 = arith.constant 0 : i32
    return %c0_i32, %c0_i32_0 : i32, i32
  }
  func.func @transform_17(%arg0: i32) -> (i32, i32) {
    %c0_i32 = arith.constant 0 : i32
    %c0_i32_0 = arith.constant 0 : i32
    %c0_i32_1 = arith.constant 0 : i32
    return %c0_i32, %c0_i32_0 : i32, i32
  }
  func.func @transform_18(%arg0: i32) -> (i32, i32, i32) {
    %c0_i32 = arith.constant 0 : i32
    %c0_i32_0 = arith.constant 0 : i32
    %c0_i32_1 = arith.constant 0 : i32
    return %arg0, %c0_i32, %c0_i32_0 : i32, i32, i32
  }
}

</mosaic_0001>

<bundles_post_ra>
// kernel: bert_legal_finetune_forward.1
= control target key start
LH: loop header
LB: loop body
LE: loop exit
PB: predicated region body
PF: predicated region fallthrough
CT: control target
= control target key end

     0   :  { %s1855_s27 = smov 0   ;;  %s2266_s0 = inlined_call_operand.vmem [shape: f32[2,8,32], index: 0, kind: input, shape index: {}]   ;;  %s2267_s1 = inlined_call_operand.vmem [shape: f32[2,32,32], index: 1, kind: input, shape index: {}]   ;;  %s2268_s2 = inlined_call_operand.vmem [shape: f32[1,32], index: 2, kind: input, shape index: {}]   ;;  %s2269_s3 = inlined_call_operand.vmem [shape: f32[1,32], index: 3, kind: input, shape index: {}]   ;;  %s2270_s4 = inlined_call_operand.vmem [shape: f32[2,32,96], index: 4, kind: input, shape index: {}]   ;;  %s2271_s5 = inlined_call_operand.vmem [shape: f32[2,1,96], index: 5, kind: input, shape index: {}]   ;;  %s2272_s6 = inlined_call_operand.vmem [shape: f32[2,32,32], index: 6, kind: input, shape index: {}]   ;;  %s2273_s7 = inlined_call_operand.vmem [shape: f32[2,1,32], index: 7, kind: input, shape index: {}]   ;;  %s2274_s8 = inlined_call_operand.vmem [shape: f32[2,1,32], index: 8, kind: input, shape index: {}]   ;;  %s2275_s9 = inlined_call_operand.vmem [shape: f32[2,1,32], index: 9, kind: input, shape index: {}]   ;;  %s2276_s10 = inlined_call_operand.vmem [shape: f32[2,32,128], index: 10, kind: input, shape index: {}]   ;;  %s2277_s11 = inlined_call_operand.vmem [shape: f32[2,1,128], index: 11, kind: input, shape index: {}]   ;;  %s2278_s12 = inlined_call_operand.vmem [shape: f32[2,128,32], index: 12, kind: input, shape index: {}]   ;;  %s2279_s13 = inlined_call_operand.vmem [shape: f32[2,1,32], index: 13, kind: input, shape index: {}]   ;;  %s2280_s14 = inlined_call_operand.vmem [shape: f32[2,1,32], index: 14, kind: input, shape index: {}]   ;;  %s2281_s15 = inlined_call_operand.vmem [shape: f32[2,1,32], index: 15, kind: input, shape index: {}]   ;;  %s2282_s16 = inlined_call_operand.vmem [shape: f32[32,256], index: 16, kind: input, shape index: {}]   ;;  %s2283_s17 = inlined_call_operand.vmem [shape: f32[1,256], index: 17, kind: input, shape index: {}]   ;;  %s2284_s18 = inlined_call_operand.vmem [shape: f32[2,1,256], index: 18, kind: output, shape index: {}]  }
   0x1   :  { %2292 = sst [smem:[#allocation2_spill]] %s2266_s0 }
   0x2   :  { %2293 = sst [smem:[#allocation3_spill]] %s2267_s1 }
   0x3   :  { %2294 = sst [smem:[#allocation4_spill]] %s2268_s2 }
   0x4 LB: > { %s1560_s28 = sadd.s32 4294967295, %s1749_s27   ;;  %p1564_p0 = scmp.ge.s32.totalorder %s1749_s27, 1  ;;  %s1749_s27 = sphi %s1855_s27, %s28_s27  }
   0x5   : > { %p521_p1 = scmp.lt.s32.totalorder %s1749_s27, 3 }
   0x7   : > { %p522_p2 = pnand %p1564_p0, %p521_p1 }
   0x8   : > { %p578_p3 = scmp.lt.s32.totalorder (!%p522_p2), %s1560_s28, 1  ;;  %s2295_s19 = sld [smem:[#allocation2_spill]] (!%p522_p2) }
   0x9   : > { %525 = sbr.rel (%p522_p2) target bundleno = 4413 (0x113d), region = 92  ;;  %s2296_s0 = sld [smem:[#allocation4_spill]] (!%p522_p2) }
   0xa   : > { %s1752_s22 = smov (!%p522_p2), 120   ;;  %s1753_s2 = smov (!%p522_p2), 104  }
   0xb   : > { %s1754_s23 = smov (!%p522_p2), 112   ;;  %s2290_s24 = smov (!%p522_p2), 96  }
   0xc   : > { %s2297_s30 = sld [smem:[#allocation3_spill]] (!%p522_p2)  ;;  %s2287_s20 = smov (!%p522_p2), 16  }
   0xd   : > { %s2289_s21 = smov (!%p522_p2), 24   ;;  %s2298_s26 = smov (!%p522_p2), 96  }
   0xe   : > { %s2304_s28 = smov (!%p578_p3, %s1560_s28), 1  ;;  %vm598_vm0 = vcmask 261120   ;;  %v1751_v2 = vmov 32.0   ;;  %v639_v14 = vld [vmem:[%s2270_s4 + $0x18] sm:$0xff]  ;;  %v638_v15 = vld [vmem:[%s2270_s4 + $0x10] sm:$0xff]  ;;  %v637_v16 = vld [vmem:[%s2270_s4 + $0x8] sm:$0xff] }
   0xf   : > { %s1565_s29 = sshll.u32 %s2304_s28, 3  ;;  %1695 = vrcp.f32 %v1751_v2  ;;  %659 = vmatpush.msra.mxu0 %v639_v14  ;;  %v636_v17 = vld [vmem:[%s2270_s4] sm:$0xff]  ;;  %vm682_vm5 = vcmask 64512   ;;  %s1639_s25 = sshll.u32 %s2304_s28, 5  ;;  %vm846_vm6 = vcmask 130048   ;;  %vm848_vm7 = vcmask 195584  }
  0x10   : > { %s581_s1 = scalar_lea.vmem %s2295_s19, %s1565_s29  ;;  %v1677_v27 = vld [vmem:[%s2296_s0] ss:$0 sm:$0xff]  ;;  %s2285_s19 = smov 64  }
  0x11   : > { %v591_v0 = vld [vmem:[%s581_s1] sm:$0xff]  ;;  %660 = vmatpush.msra.mxu0 %v638_v15  ;;  %s2288_s1 = smov 8  }
  0x12   : > { %v599_v1 = vsel %vm598_vm0, %v591_v0, 0.0  ;;  %v1678_v30 = vld [vmem:[%s2269_s3] ss:$0 sm:$0xff]  ;;  %s586_s0 = scalar_lea.vmem %s2297_s30, %s1639_s25 }
  0x13   : > { %600 = vadd.xlane.f32.xlu0 %v599_v1  ;;  %661 = vmatpush.msra.mxu0 %v637_v16  ;;  %v1679_v33 = vld [vmem:[%s2271_s5] ss:$0 sm:$0xff]  ;;  %v1934_v49 = vld [vmem:[%s586_s0 + $0x8] sm:$0xff]  ;;  %v1938_v54 = vld [vmem:[%s586_s0 + $0x10] sm:$0xff] }
  0x14   : > { %v1930_v44 = vld [vmem:[%s586_s0] sm:$0xff]  ;;  %v1942_v59 = vld [vmem:[%s586_s0 + $0x18] sm:$0xff]  ;;  %s2300_s0 = smov 8  }
  0x15   : > { %v1696_v3 = vpop.eup %1695  ;;  %662 = vmatpush.msra.mxu0 %v636_v17 }
  0x16   : > { %v603_v4 = vmul.f32 32.0, %v1696_v3  ;;  %vm607_vm1 = vweird.f32 %v1696_v3 }
  0x18   : > { %v604_v5 = vsub.f32 1.0, %v603_v4 }
  0x1a   : > { %v605_v6 = vmul.f32 %v1696_v3, %v604_v5 }
  0x1c   : > { %v606_v7 = vadd.f32 %v1696_v3, %v605_v6 }
  0x1e   : > { %v1870_v8 = vsel %vm607_vm1, %v1696_v3, %v606_v7 }
  0x86   : > { %v601_v9 = vpop.xlane.xlu0 %600 }
  0x87   : > { %v609_v10 = vmul.f32 %v1870_v8, %v601_v9 }
  0x89   : > { %v610_v11 = vsub.f32 %v591_v0, %v609_v10 }
  0x8b   : > { %v611_v12 = vmul.f32 %v610_v11, %v610_v11 }
  0x8d   : > { %v612_v13 = vsel %vm598_vm0, %v611_v12, 0.0 }
  0x8e   : > { %613 = vadd.xlane.f32.xlu0 %v612_v13 }
 0x101   : > { %v614_v18 = vpop.xlane.xlu0 %613 }
 0x102   : > { %v615_v19 = vmul.f32 %v614_v18, %v1870_v8 }
 0x104   : > { %v616_v20 = vadd.f32 1e-12, %v615_v19 }
 0x106   : > { %1697 = vrsqrt.f32 %v616_v20  ;;  %vm623_vm3 = vweird.f32 %v616_v20 }
 0x10c   : > { %v1698_v21 = vpop.eup %1697 }
 0x10d   : > { %v618_v22 = vmul.f32 %v1698_v21, %v616_v20  ;;  %vm624_vm2 = vweird.f32 %v1698_v21 }
 0x10e   : > { %vm625_vm4 = vmor %vm623_vm3, %vm624_vm2 }
 0x10f   : > { %v619_v23 = vmul.f32 %v1698_v21, %v618_v22 }
 0x111   : > { %v620_v24 = vmul.f32 0.5, %v619_v23 }
 0x113   : > { %v621_v25 = vsub.f32 1.5, %v620_v24 }
 0x115   : > { %v622_v26 = vmul.f32 %v1698_v21, %v621_v25 }
 0x117   : > { %v626_v28 = vsel %vm625_vm4, %v1698_v21, %v622_v26 }
 0x118   : > { %v627_v29 = vmul.f32 %v626_v28, %v610_v11 }
 0x11a   : > { %v631_v31 = vmul.f32 %v1677_v27, %v627_v29 }
 0x11c   : > { %v1893_v32 = vadd.f32 %v1678_v30, %v631_v31 }
 0x11e   : > { %1569 = vmatmul.msk.f32.vlgmr.msra.gmra.mxu0 %vm598_vm0, %v1893_v32 }
 0x19b   : > { %v664_v34 = vpop.f32.mrf.mxu0 }
 0x19c   : > { %v1900_v35 = vadd.f32 %v1679_v33, %v664_v34 }
 0x19e   : > { %668 = vrot.lane.b32.xlu2 %v1900_v35, %s1752_s22  ;;  %672 = vrot.lane.b32.xlu1 %v1900_v35, %s1753_s2 }
 0x1a6   : > { %670 = vrot.lane.b32.xlu1 %v1900_v35, %s1754_s23 }
 0x1f8   : > { %v1908_v36 = vpop.permute.xlu2 %668 }
 0x1f9   : > { %676 = vrot.lane.b32.xlu1 %v1908_v36, %s2290_s24  ;;  %v1662_v23 = vpack.i.bf16 %v1900_v35, %v1908_v36 }
 0x210   : > { %v673_v37 = vpop.permute.xlu1 %672 }
 0x211   : > { %680 = vrot.lane.b32.xlu2 %v673_v37, %s2290_s24 }
 0x218   : > { %v671_v38 = vpop.permute.xlu1 %670 }
 0x219   : > { %674 = vrot.lane.b32.xlu2 %v1900_v35, %s2290_s24  ;;  %678 = vrot.lane.b32.xlu0 %v671_v38, %s2290_s24  ;;  %v1657_v63 = vpack.i.bf16 %v671_v38, %v673_v37  ;;  %s2301_s24 = smov 16  }
 0x26b   : > { %v681_v39 = vpop.permute.xlu2 %680  ;;  %v677_v41 = vpop.permute.xlu1 %676 }
 0x26c   : > { %1570 = vmatpush.xpose.msk.msra.mxu1 %vm682_vm5, %v681_v39 }
 0x273   : > { %v675_v42 = vpop.permute.xlu2 %674 }
 0x28b   : > { %v679_v40 = vpop.permute.xlu0 %678 }
 0x28c   : > { %1571 = vmatpush.xpose.msk.msra.mxu1 %vm682_vm5, %v679_v40 }
 0x290   : > { %1572 = vmatpush.xpose.msk.msra.mxu1 %vm682_vm5, %v677_v41 }
 0x294   : > { %1573 = vmatpush.xpose.msk.msra.mxu1 %vm682_vm5, %v675_v42 }
 0x297   : > { %1574 = vmatmul.msk.f32.vlgmr.msra.gmra.mxu1 %vm682_vm5, %v1900_v35 }
 0x29f   : > { %1575 = vmatmul.msk.f32.gmra.mxu1 %vm682_vm5, %v1908_v36 }
 0x2a7   : > { %1576 = vmatmul.msk.f32.gmra.mxu1 %vm682_vm5, %v671_v38 }
 0x2af   : > { %1577 = vmatmul.msk.f32.gmra.mxu1 %vm682_vm5, %v673_v37 }
 0x314   : > { %v716_v43 = vpop.f32.mrf.mxu1 }
 0x315   : > { %v728_v45 = vmul.f32 0.35355338, %v716_v43 }
 0x317   : > { %v732_v46 = vadd.f32 %v728_v45, %v1930_v44 }
 0x319   : > { %v736_v47 = vsel %vm598_vm0, %v732_v46, -inf }
 0x31a   : > { %737 = vmax.xlane.f32.xlu1 %v736_v47  ;;  %v852_v47 = vld [vmem:[%s2272_s6 + $0x10] sm:$0xff] }
 0x31c   : > { %v719_v48 = vpop.f32.mrf.mxu1 }
 0x31d   : > { %v729_v50 = vmul.f32 0.35355338, %v719_v48  ;;  %v851_v48 = vld [vmem:[%s2272_s6 + $0x8] sm:$0xff] }
 0x31f   : > { %v733_v51 = vadd.f32 %v729_v50, %v1934_v49  ;;  %v850_v50 = vld [vmem:[%s2272_s6] sm:$0xff] }
 0x321   : > { %v739_v52 = vsel %vm598_vm0, %v733_v51, -inf }
 0x322   : > { %740 = vmax.xlane.f32.xlu2 %v739_v52 }
 0x324   : > { %v722_v53 = vpop.f32.mrf.mxu1 }
 0x325   : > { %v730_v55 = vmul.f32 0.35355338, %v722_v53 }
 0x327   : > { %v734_v56 = vadd.f32 %v730_v55, %v1938_v54 }
 0x329   : > { %v742_v57 = vsel %vm598_vm0, %v734_v56, -inf }
 0x32a   : > { %743 = vmax.xlane.f32.xlu0 %v742_v57 }
 0x32c   : > { %v725_v58 = vpop.f32.mrf.mxu1 }
 0x32d   : > { %v731_v60 = vmul.f32 0.35355338, %v725_v58  ;;  %v1680_v58 = vld [vmem:[%s2273_s7] ss:$0 sm:$0xff] }
 0x32f   : > { %v735_v61 = vadd.f32 %v731_v60, %v1942_v59 }
 0x331   : > { %v745_v62 = vsel %vm598_vm0, %v735_v61, -inf }
 0x332   : > { %746 = vmax.xlane.f32.xlu2 %v745_v62 }
 0x34a   : > { %1658 = vrot.lane.b32.xlu2 %v1657_v63, %s2285_s19 }
 0x38d   : > { %v738_v0 = vpop.xlane.xlu1 %737 }
 0x38e   : > { %v748_v1 = vsub.f32 %v732_v46, %v738_v0  ;;  %v853_v46 = vld [vmem:[%s2272_s6 + $0x18] sm:$0xff] }
 0x38f   : > { %873 = vmatpush.msra.mxu3 %v853_v46 }
 0x390   : > { %v752_v2 = vmul.f32 1.442695, %v748_v1 }
 0x391   : > { %874 = vmatpush.msra.mxu3 %v852_v47 }
 0x392   : > { %1699 = vpow2.f32 %v752_v2 }
 0x393   : > { %875 = vmatpush.msra.mxu3 %v851_v48 }
 0x395   : > { %v741_v3 = vpop.xlane.xlu2 %740  ;;  %876 = vmatpush.msra.mxu3 %v850_v50 }
 0x396   : > { %v749_v4 = vsub.f32 %v733_v51, %v741_v3 }
 0x398   : > { %v1700_v5 = vpop.eup %1699  ;;  %v754_v6 = vmul.f32 1.442695, %v749_v4 }
 0x399   : > { %v760_v7 = vsel %vm598_vm0, %v1700_v5, 0.0 }
 0x39a   : > { %1701 = vpow2.f32 %v754_v6  ;;  %761 = vadd.xlane.f32.xlu1 %v760_v7  ;;  %v915_v6 = vld [vmem:[%s2276_s10 + $0x8] sm:$0xff]  ;;  %v914_v7 = vld [vmem:[%s2276_s10] sm:$0xff] }
 0x39d   : > { %v744_v9 = vpop.xlane.xlu0 %743 }
 0x39e   : > { %v750_v10 = vsub.f32 %v734_v56, %v744_v9  ;;  %v969_v9 = vld [vmem:[%s2278_s12 + $0x78] sm:$0xff] }
 0x3a0   : > { %v1702_v11 = vpop.eup %1701  ;;  %v756_v12 = vmul.f32 1.442695, %v750_v10  ;;  %v968_v10 = vld [vmem:[%s2278_s12 + $0x70] sm:$0xff] }
 0x3a1   : > { %v763_v13 = vsel %vm598_vm0, %v1702_v11, 0.0 }
 0x3a2   : > { %1703 = vpow2.f32 %v756_v12  ;;  %764 = vadd.xlane.f32.xlu0 %v763_v13 }
 0x3a5   : > { %v747_v14 = vpop.xlane.xlu2 %746 }
 0x3a6   : > { %v751_v15 = vsub.f32 %v735_v61, %v747_v14  ;;  %v966_v14 = vld [vmem:[%s2278_s12 + $0x60] sm:$0xff] }
 0x3a8   : > { %v1704_v16 = vpop.eup %1703  ;;  %v758_v17 = vmul.f32 1.442695, %v751_v15 }
 0x3a9   : > { %v766_v18 = vsel %vm598_vm0, %v1704_v16, 0.0 }
 0x3aa   : > { %1705 = vpow2.f32 %v758_v17  ;;  %767 = vadd.xlane.f32.xlu0 %v766_v18 }
 0x3ad   : > { %v1659_v19 = vpop.permute.xlu2 %1658 }
 0x3ae   : > { %v1660_v20 = vunpack.i.l.bf16 %v1659_v19  ;;  %v1661_v22 = vunpack.i.h.bf16 %v1659_v19 }
 0x3b0   : > { %v1706_v21 = vpop.eup %1705  ;;  %816 = vmatpush.msra.mxu2 %v1660_v20 }
 0x3b1   : > { %v769_v24 = vsel %vm598_vm0, %v1706_v21, 0.0 }
 0x3b2   : > { %770 = vadd.xlane.f32.xlu0 %v769_v24  ;;  %817 = vmatpush.msra.mxu2 %v1661_v22  ;;  %v1681_v22 = vld [vmem:[%s2274_s8] ss:$0 sm:$0xff] }
 0x3b3   : > { %1663 = vrot.lane.b32.xlu1 %v1662_v23, %s2285_s19 }
 0x40d   : > { %v762_v25 = vpop.xlane.xlu1 %761 }
 0x40e   : > { %1707 = vrcp.f32 %v762_v25  ;;  %v1682_v25 = vld [vmem:[%s2275_s9] ss:$0 sm:$0xff] }
 0x414   : > { %v1708_v28 = vpop.eup %1707 }
 0x415   : > { %v765_v26 = vpop.xlane.xlu0 %764  ;;  %v776_v31 = vmul.f32 %v1708_v28, %v1700_v5  ;;  %v917_v5 = vld [vmem:[%s2276_s10 + $0x18] sm:$0xff] }
 0x416   : > { %1709 = vrcp.f32 %v765_v26  ;;  %937 = vmatpush.msrb.mxu0 %v917_v5  ;;  %v965_v28 = vld [vmem:[%s2278_s12 + $0x58] sm:$0xff]  ;;  %v1585_v5 = vld [vmem:[%s2270_s4 + $0x28] sm:$0xff] }
 0x41c   : > { %v1710_v34 = vpop.eup %1709 }
 0x41d   : > { %v768_v33 = vpop.xlane.xlu0 %767  ;;  %v777_v35 = vmul.f32 %v1710_v34, %v1702_v11  ;;  %v967_v11 = vld [vmem:[%s2278_s12 + $0x68] sm:$0xff]  ;;  %v960_v34 = vld [vmem:[%s2278_s12 + $0x30] sm:$0xff] }
 0x41e   : > { %1711 = vrcp.f32 %v768_v33  ;;  %v961_v33 = vld [vmem:[%s2278_s12 + $0x38] sm:$0xff] }
 0x424   : > { %v1712_v37 = vpop.eup %1711 }
 0x425   : > { %v1664_v27 = vpop.permute.xlu1 %1663  ;;  %v771_v36 = vpop.xlane.xlu0 %770  ;;  %v778_v38 = vmul.f32 %v1712_v37, %v1704_v16  ;;  %v957_v37 = vld [vmem:[%s2278_s12 + $0x18] sm:$0xff] }
 0x426   : > { %v1665_v29 = vunpack.i.l.bf16 %v1664_v27  ;;  %v1666_v30 = vunpack.i.h.bf16 %v1664_v27  ;;  %1713 = vrcp.f32 %v771_v36  ;;  %v958_v36 = vld [vmem:[%s2278_s12 + $0x20] sm:$0xff] }
 0x428   : > { %818 = vmatpush.msra.mxu2 %v1665_v29  ;;  %v964_v29 = vld [vmem:[%s2278_s12 + $0x50] sm:$0xff] }
 0x42a   : > { %819 = vmatpush.msra.mxu2 %v1666_v30  ;;  %v963_v30 = vld [vmem:[%s2278_s12 + $0x48] sm:$0xff] }
 0x42b   : > { %1578 = vmatmul.msk.f32.vlgmr.msra.gmra.mxu2 %vm598_vm0, %v776_v31  ;;  %v962_v31 = vld [vmem:[%s2278_s12 + $0x40] sm:$0xff] }
 0x42c   : > { %v1714_v39 = vpop.eup %1713  ;;  %974 = vmatpush.msrb.mxu2 %v969_v9 }
 0x42d   : > { %v779_v40 = vmul.f32 %v1714_v39, %v1706_v21  ;;  %v955_v39 = vld [vmem:[%s2278_s12 + $0x8] sm:$0xff] }
 0x42e   : > { %975 = vmatpush.msrb.mxu2 %v968_v10 }
 0x430   : > { %976 = vmatpush.msrb.mxu2 %v967_v11 }
 0x432   : > { %977 = vmatpush.msrb.mxu2 %v966_v14 }
 0x433   : > { %1579 = vmatmul.msk.f32.gmra.mxu2 %vm598_vm0, %v777_v35  ;;  %v959_v35 = vld [vmem:[%s2278_s12 + $0x28] sm:$0xff] }
 0x434   : > { %978 = vmatpush.msrb.mxu2 %v965_v28 }
 0x436   : > { %979 = vmatpush.msrb.mxu2 %v964_v29 }
 0x438   : > { %980 = vmatpush.msrb.mxu2 %v963_v30 }
 0x43a   : > { %981 = vmatpush.msrb.mxu2 %v962_v31 }
 0x43b   : > { %1580 = vmatmul.msk.f32.gmra.mxu2 %vm598_vm0, %v778_v38  ;;  %v956_v38 = vld [vmem:[%s2278_s12 + $0x10] sm:$0xff] }
 0x43c   : > { %982 = vmatpush.msrb.mxu2 %v961_v33 }
 0x43e   : > { %983 = vmatpush.msrb.mxu2 %v960_v34 }
 0x440   : > { %984 = vmatpush.msrb.mxu2 %v959_v35 }
 0x442   : > { %985 = vmatpush.msrb.mxu2 %v958_v36 }
 0x443   : > { %1581 = vmatmul.msk.f32.gmra.mxu2 %vm598_vm0, %v779_v40  ;;  %v954_v40 = vld [vmem:[%s2278_s12] sm:$0xff] }
 0x444   : > { %986 = vmatpush.msrb.mxu2 %v957_v37 }
 0x446   : > { %987 = vmatpush.msrb.mxu2 %v956_v38 }
 0x448   : > { %988 = vmatpush.msrb.mxu2 %v955_v39 }
 0x44a   : > { %989 = vmatpush.msrb.mxu2 %v954_v40 }
 0x4ae   : > { %v821_v41 = vpop.f32.mrf.mxu2 }
 0x4b6   : > { %v824_v42 = vpop.f32.mrf.mxu2 }
 0x4b7   : > { %834 = vrot.lane.b32.xlu2 %v824_v42, %s2288_s1 }
 0x4be   : > { %v827_v43 = vpop.f32.mrf.mxu2 }
 0x4bf   : > { %838 = vrot.lane.b32.xlu1 %v827_v43, %s2287_s20 }
 0x4c6   : > { %v830_v45 = vpop.f32.mrf.mxu2 }
 0x4c7   : > { %842 = vrot.lane.b32.xlu0 %v830_v45, %s2289_s21  ;;  %s2302_s21 = smov 24  }
 0x511   : > { %v835_v51 = vpop.permute.xlu2 %834 }
 0x512   : > { %v845_v53 = vsel %vm682_vm5, %v821_v41, %v835_v51  ;;  %v1683_v41 = vld [vmem:[%s2277_s11] ss:$0 sm:$0xff] }
 0x531   : > { %v839_v52 = vpop.permute.xlu1 %838 }
 0x532   : > { %v847_v55 = vsel %vm846_vm6, %v845_v53, %v839_v52 }
 0x539   : > { %v843_v56 = vpop.permute.xlu0 %842 }
 0x53a   : > { %v849_v57 = vsel %vm848_vm7, %v847_v55, %v843_v56  ;;  %v1684_v56 = vld [vmem:[%s2279_s13] ss:$0 sm:$0xff] }
 0x53b   : > { %1582 = vmatmul.msk.f32.vlgmr.msra.gmra.mxu3 %vm598_vm0, %v849_v57 }
 0x5be   : > { %v878_v60 = vpop.f32.mrf.mxu3 }
 0x5bf   : > { %v879_v61 = vadd.f32 %v1680_v58, %v878_v60 }
 0x5c1   : > { %v881_v62 = vadd.f32 %v879_v61, %v1893_v32  ;;  %v916_v32 = vld [vmem:[%s2276_s10 + $0x10] sm:$0xff] }
 0x5c2   : > { %938 = vmatpush.msrb.mxu0 %v916_v32  ;;  %v1584_v32 = vld [vmem:[%s2270_s4 + $0x20] sm:$0xff] }
 0x5c3   : > { %v884_v63 = vsel %vm598_vm0, %v881_v62, 0.0 }
 0x5c4   : > { %885 = vadd.xlane.f32.xlu2 %v884_v63  ;;  %939 = vmatpush.msrb.mxu0 %v915_v6 }
 0x5c6   : > { %940 = vmatpush.msrb.mxu0 %v914_v7 }
 0x637   : > { %v886_v0 = vpop.xlane.xlu2 %885 }
 0x638   : > { %v887_v1 = vmul.f32 %v886_v0, %v1870_v8 }
 0x63a   : > { %v888_v2 = vsub.f32 %v881_v62, %v887_v1 }
 0x63c   : > { %v889_v3 = vmul.f32 %v888_v2, %v888_v2 }
 0x63e   : > { %v890_v4 = vsel %vm598_vm0, %v889_v3, 0.0  ;;  %v1587_v3 = vld [vmem:[%s2270_s4 + $0x38] sm:$0xff] }
 0x63f   : > { %891 = vadd.xlane.f32.xlu1 %v890_v4  ;;  %1052 = vmatpush.msrb.mxu3 %v1587_v3  ;;  %v1586_v4 = vld [vmem:[%s2270_s4 + $0x30] sm:$0xff] }
 0x641   : > { %1053 = vmatpush.msrb.mxu3 %v1586_v4 }
 0x643   : > { %1054 = vmatpush.msrb.mxu3 %v1585_v5 }
 0x645   : > { %1055 = vmatpush.msrb.mxu3 %v1584_v32 }
 0x6b2   : > { %v892_v12 = vpop.xlane.xlu1 %891 }
 0x6b3   : > { %v893_v13 = vmul.f32 %v892_v12, %v1870_v8 }
 0x6b5   : > { %v894_v15 = vadd.f32 1e-12, %v893_v13 }
 0x6b7   : > { %1715 = vrsqrt.f32 %v894_v15  ;;  %vm901_vm9 = vweird.f32 %v894_v15 }
 0x6bd   : > { %v1716_v16 = vpop.eup %1715 }
 0x6be   : > { %v896_v17 = vmul.f32 %v1716_v16, %v894_v15  ;;  %vm902_vm8 = vweird.f32 %v1716_v16 }
 0x6bf   : > { %vm903_vm10 = vmor %vm901_vm9, %vm902_vm8 }
 0x6c0   : > { %v897_v18 = vmul.f32 %v1716_v16, %v896_v17 }
 0x6c2   : > { %v898_v19 = vmul.f32 0.5, %v897_v18 }
 0x6c4   : > { %v899_v20 = vsub.f32 1.5, %v898_v19  ;;  %v1686_v19 = vld [vmem:[%s2281_s15] ss:$0 sm:$0xff] }
 0x6c6   : > { %v900_v21 = vmul.f32 %v1716_v16, %v899_v20 }
 0x6c8   : > { %v904_v23 = vsel %vm903_vm10, %v1716_v16, %v900_v21  ;;  %v1685_v16 = vld [vmem:[%s2280_s14] ss:$0 sm:$0xff] }
 0x6c9   : > { %v905_v24 = vmul.f32 %v904_v23, %v888_v2 }
 0x6cb   : > { %v909_v26 = vmul.f32 %v1681_v22, %v905_v24  ;;  %v1687_v22 = vld [vmem:[%s2271_s5 + $0x1] ss:$0 sm:$0xff] }
 0x6cd   : > { %v913_v27 = vadd.f32 %v1682_v25, %v909_v26 }
 0x6cf   : > { %1583 = vmatmul.msk.f32.vlgmr.msrb.gmra.mxu0 %vm598_vm0, %v913_v27 }
 0x74c   : > { %v942_v42 = vpop.f32.mrf.mxu0 }
 0x74d   : > { %v943_v43 = vadd.f32 %v1683_v41, %v942_v42 }
 0x74f   : > { %v946_v45 = vmul.f32 0.044715, %v943_v43  ;;  %v945_v52 = vmul.f32 0.5, %v943_v43 }
 0x751   : > { %v947_v46 = vmul.f32 %v946_v45, %v943_v43 }
 0x753   : > { %v948_v47 = vmul.f32 %v947_v46, %v943_v43 }
 0x755   : > { %v949_v48 = vadd.f32 %v948_v47, %v943_v43 }
 0x757   : > { %v950_v50 = vmul.f32 0.7978846, %v949_v48 }
 0x759   : > { %1717 = vtanh.f32 %v950_v50 }
 0x75f   : > { %v1718_v51 = vpop.eup %1717 }
 0x760   : > { %v952_v53 = vadd.f32 1.0, %v1718_v51 }
 0x762   : > { %v953_v55 = vmul.f32 %v952_v53, %v945_v52 }
 0x764   : > { %990 = vmatmul.f32.vlgmr.msrb.gmra.mxu2 %v953_v55 }
 0x7e7   : > { %v991_v57 = vpop.f32.mrf.mxu2 }
 0x7e8   : > { %v992_v58 = vadd.f32 %v1684_v56, %v991_v57 }
 0x7ea   : > { %v994_v60 = vadd.f32 %v992_v58, %v913_v27 }
 0x7ec   : > { %v997_v61 = vsel %vm598_vm0, %v994_v60, 0.0 }
 0x7ed   : > { %998 = vadd.xlane.f32.xlu0 %v997_v61 }
 0x860   : > { %v999_v62 = vpop.xlane.xlu0 %998 }
 0x861   : > { %v1000_v63 = vmul.f32 %v999_v62, %v1870_v8 }
 0x863   : > { %v1001_v0 = vsub.f32 %v994_v60, %v1000_v63 }
 0x865   : > { %v1002_v1 = vmul.f32 %v1001_v0, %v1001_v0 }
 0x867   : > { %v1003_v2 = vsel %vm598_vm0, %v1002_v1, 0.0 }
 0x868   : > { %1004 = vadd.xlane.f32.xlu2 %v1003_v2 }
 0x8db   : > { %v1005_v6 = vpop.xlane.xlu2 %1004 }
 0x8dc   : > { %v1006_v7 = vmul.f32 %v1005_v6, %v1870_v8 }
 0x8de   : > { %v1007_v9 = vadd.f32 1e-12, %v1006_v7 }
 0x8e0   : > { %1719 = vrsqrt.f32 %v1007_v9  ;;  %vm1014_vm12 = vweird.f32 %v1007_v9 }
 0x8e6   : > { %v1720_v10 = vpop.eup %1719 }
 0x8e7   : > { %v1009_v11 = vmul.f32 %v1720_v10, %v1007_v9  ;;  %vm1015_vm11 = vweird.f32 %v1720_v10 }
 0x8e8   : > { %vm1016_vm13 = vmor %vm1014_vm12, %vm1015_vm11 }
 0x8e9   : > { %v1010_v12 = vmul.f32 %v1720_v10, %v1009_v11 }
 0x8eb   : > { %v1011_v13 = vmul.f32 0.5, %v1010_v12 }
 0x8ed   : > { %v1012_v14 = vsub.f32 1.5, %v1011_v13 }
 0x8ef   : > { %v1013_v15 = vmul.f32 %v1720_v10, %v1012_v14 }
 0x8f1   : > { %v1017_v17 = vsel %vm1016_vm13, %v1720_v10, %v1013_v15 }
 0x8f2   : > { %v1018_v18 = vmul.f32 %v1017_v17, %v1001_v0 }
 0x8f4   : > { %v1022_v20 = vmul.f32 %v1685_v16, %v1018_v18 }
 0x8f6   : > { %v2080_v21 = vadd.f32 %v1686_v19, %v1022_v20 }
 0x8f8   : > { %1589 = vmatmul.msk.f32.vlgmr.msrb.gmra.mxu3 %vm598_vm0, %v2080_v21 }
 0x97b   : > { %v1057_v23 = vpop.f32.mrf.mxu3 }
 0x97c   : > { %v1058_v24 = vadd.f32 %v1687_v22, %v1057_v23 }
 0x97e   : > { %1061 = vrot.lane.b32.xlu0 %v1058_v24, %s1752_s22  ;;  %1063 = vrot.lane.b32.xlu2 %v1058_v24, %s1754_s23  ;;  %s2299_s22 = smov 64  }
 0x97f   : > { %1065 = vrot.lane.b32.xlu1 %v1058_v24, %s1753_s2 }
 0x986   : > { %1067 = vrot.lane.b32.xlu0 %v1058_v24, %s2298_s26 }
 0x9d8   : > { %v1064_v25 = vpop.permute.xlu2 %1063 }
 0x9d9   : > { %1071 = vrot.lane.b32.xlu2 %v1064_v25, %s2298_s26 }
 0x9f0   : > { %v1062_v27 = vpop.permute.xlu0 %1061 }
 0x9f1   : > { %v1066_v26 = vpop.permute.xlu1 %1065 }
 0x9f2   : > { %1073 = vrot.lane.b32.xlu1 %v1066_v26, %s2298_s26  ;;  %v1667_v50 = vpack.i.bf16 %v1064_v25, %v1066_v26 }
 0x9f8   : > { %v1068_v31 = vpop.permute.xlu0 %1067 }
 0x9fa   : > { %1069 = vrot.lane.b32.xlu1 %v1062_v27, %s2298_s26 }
 0xa33   : > { %v1072_v29 = vpop.permute.xlu2 %1071 }
 0xa64   : > { %v1074_v28 = vpop.permute.xlu1 %1073 }
 0xa65   : > { %1590 = vmatpush.xpose.msk.msra.mxu0 %vm682_vm5, %v1074_v28 }
 0xa69   : > { %1591 = vmatpush.xpose.msk.msra.mxu0 %vm682_vm5, %v1072_v29 }
 0xa6c   : > { %v1070_v30 = vpop.permute.xlu1 %1069 }
 0xa6d   : > { %1592 = vmatpush.xpose.msk.msra.mxu0 %vm682_vm5, %v1070_v30 }
 0xa71   : > { %1593 = vmatpush.xpose.msk.msra.mxu0 %vm682_vm5, %v1068_v31 }
 0xa74   : > { %1594 = vmatmul.msk.f32.vlgmr.msra.gmra.mxu0 %vm682_vm5, %v1058_v24 }
 0xa7c   : > { %1595 = vmatmul.msk.f32.gmra.mxu0 %vm682_vm5, %v1062_v27 }
 0xa84   : > { %1596 = vmatmul.msk.f32.gmra.mxu0 %vm682_vm5, %v1064_v25 }
 0xa8c   : > { %1597 = vmatmul.msk.f32.gmra.mxu0 %vm682_vm5, %v1066_v26  ;;  %v1605_v26 = vld [vmem:[%s2272_s6 + $0x38] sm:$0xff] }
 0xa8d   : > { %1265 = vmatpush.msrb.mxu1 %v1605_v26 }
 0xaf1   : > { %v1108_v33 = vpop.f32.mrf.mxu0 }
 0xaf2   : > { %v1120_v34 = vmul.f32 0.35355338, %v1108_v33  ;;  %v1603_v33 = vld [vmem:[%s2272_s6 + $0x28] sm:$0xff] }
 0xaf4   : > { %v1124_v35 = vadd.f32 %v1120_v34, %v1930_v44  ;;  %v1602_v34 = vld [vmem:[%s2272_s6 + $0x20] sm:$0xff] }
 0xaf6   : > { %v1128_v36 = vsel %vm598_vm0, %v1124_v35, -inf }
 0xaf7   : > { %1129 = vmax.xlane.f32.xlu2 %v1128_v36 }
 0xaf9   : > { %v1111_v37 = vpop.f32.mrf.mxu0 }
 0xafa   : > { %v1121_v38 = vmul.f32 0.35355338, %v1111_v37 }
 0xafc   : > { %v1125_v39 = vadd.f32 %v1121_v38, %v1934_v49  ;;  %v1672_v49 = vpack.i.bf16 %v1058_v24, %v1062_v27  ;;  %v1604_v27 = vld [vmem:[%s2272_s6 + $0x30] sm:$0xff] }
 0xafd   : > { %1266 = vmatpush.msrb.mxu1 %v1604_v27 }
 0xafe   : > { %v1131_v40 = vsel %vm598_vm0, %v1125_v39, -inf }
 0xaff   : > { %1132 = vmax.xlane.f32.xlu1 %v1131_v40  ;;  %1267 = vmatpush.msrb.mxu1 %v1603_v33 }
 0xb01   : > { %v1114_v41 = vpop.f32.mrf.mxu0  ;;  %1268 = vmatpush.msrb.mxu1 %v1602_v34 }
 0xb02   : > { %v1122_v42 = vmul.f32 0.35355338, %v1114_v41  ;;  %v1688_v41 = vld [vmem:[%s2273_s7 + $0x1] ss:$0 sm:$0xff] }
 0xb04   : > { %v1126_v43 = vadd.f32 %v1122_v42, %v1938_v54 }
 0xb06   : > { %v1134_v45 = vsel %vm598_vm0, %v1126_v43, -inf }
 0xb07   : > { %1135 = vmax.xlane.f32.xlu0 %v1134_v45 }
 0xb09   : > { %v1117_v46 = vpop.f32.mrf.mxu0 }
 0xb0a   : > { %v1123_v47 = vmul.f32 0.35355338, %v1117_v46 }
 0xb0c   : > { %v1127_v44 = vadd.f32 %v1123_v47, %v1942_v59 }
 0xb0e   : > { %v1137_v48 = vsel %vm598_vm0, %v1127_v44, -inf }
 0xb0f   : > { %1138 = vmax.xlane.f32.xlu2 %v1137_v48 }
 0xb1b   : > { %1668 = vrot.lane.b32.xlu0 %v1667_v50, %s2299_s22 }
 0xb27   : > { %1673 = vrot.lane.b32.xlu2 %v1672_v49, %s2299_s22 }
 0xb6a   : > { %v1130_v51 = vpop.xlane.xlu2 %1129 }
 0xb6b   : > { %v1140_v52 = vsub.f32 %v1124_v35, %v1130_v51  ;;  %v1613_v51 = vld [vmem:[%s2276_s10 + $0x38] sm:$0xff] }
 0xb6c   : > { %1333 = vmatpush.msra.mxu2 %v1613_v51  ;;  %v1428_v51 = vld [vmem:[%s2282_s16 + $0x8] sm:$0xff] }
 0xb6d   : > { %v1144_v53 = vmul.f32 1.442695, %v1140_v52  ;;  %v1611_v52 = vld [vmem:[%s2276_s10 + $0x28] sm:$0xff] }
 0xb6f   : > { %1721 = vpow2.f32 %v1144_v53  ;;  %v1610_v53 = vld [vmem:[%s2276_s10 + $0x20] sm:$0xff] }
 0xb72   : > { %v1133_v54 = vpop.xlane.xlu1 %1132 }
 0xb73   : > { %v1141_v55 = vsub.f32 %v1125_v39, %v1133_v54  ;;  %v1631_v54 = vld [vmem:[%s2278_s12 + $0xf8] sm:$0xff] }
 0xb75   : > { %v1722_v56 = vpop.eup %1721  ;;  %v1146_v57 = vmul.f32 1.442695, %v1141_v55  ;;  %v1630_v55 = vld [vmem:[%s2278_s12 + $0xf0] sm:$0xff] }
 0xb76   : > { %v1152_v58 = vsel %vm598_vm0, %v1722_v56, 0.0 }
 0xb77   : > { %1723 = vpow2.f32 %v1146_v57  ;;  %1153 = vadd.xlane.f32.xlu1 %v1152_v58 }
 0xb7a   : > { %v1136_v59 = vpop.xlane.xlu0 %1135 }
 0xb7b   : > { %v1142_v60 = vsub.f32 %v1126_v43, %v1136_v59  ;;  %v1628_v59 = vld [vmem:[%s2278_s12 + $0xe0] sm:$0xff] }
 0xb7d   : > { %v1724_v61 = vpop.eup %1723  ;;  %v1148_v62 = vmul.f32 1.442695, %v1142_v60 }
 0xb7e   : > { %v1155_v63 = vsel %vm598_vm0, %v1724_v61, 0.0 }
 0xb7f   : > { %1725 = vpow2.f32 %v1148_v62  ;;  %1156 = vadd.xlane.f32.xlu1 %v1155_v63 }
 0xb82   : > { %v1139_v0 = vpop.xlane.xlu2 %1138 }
 0xb83   : > { %v1143_v1 = vsub.f32 %v1127_v44, %v1139_v0 }
 0xb85   : > { %v1726_v2 = vpop.eup %1725  ;;  %v1150_v3 = vmul.f32 1.442695, %v1143_v1 }
 0xb86   : > { %v1158_v4 = vsel %vm598_vm0, %v1726_v2, 0.0 }
 0xb87   : > { %1727 = vpow2.f32 %v1150_v3  ;;  %1159 = vadd.xlane.f32.xlu1 %v1158_v4  ;;  %v1689_v3 = vld [vmem:[%s2274_s8 + $0x1] ss:$0 sm:$0xff] }
 0xb8a   : > { %v1674_v9 = vpop.permute.xlu2 %1673 }
 0xb8b   : > { %v1675_v11 = vunpack.i.l.bf16 %v1674_v9  ;;  %v1676_v12 = vunpack.i.h.bf16 %v1674_v9  ;;  %v1627_v9 = vld [vmem:[%s2278_s12 + $0xd8] sm:$0xff] }
 0xb8d   : > { %v1728_v5 = vpop.eup %1727  ;;  %v1669_v32 = vpop.permute.xlu0 %1668 }
 0xb8e   : > { %v1670_v6 = vunpack.i.l.bf16 %v1669_v32  ;;  %v1161_v7 = vsel %vm598_vm0, %v1728_v5, 0.0  ;;  %v1671_v10 = vunpack.i.h.bf16 %v1669_v32  ;;  %v1690_v32 = vld [vmem:[%s2275_s9 + $0x1] ss:$0 sm:$0xff] }
 0xb8f   : > { %1162 = vadd.xlane.f32.xlu0 %v1161_v7 }
 0xb90   : > { %1208 = vmatpush.msra.mxu3 %v1670_v6 }
 0xb92   : > { %1209 = vmatpush.msra.mxu3 %v1671_v10  ;;  %v1626_v10 = vld [vmem:[%s2278_s12 + $0xd0] sm:$0xff] }
 0xb94   : > { %1210 = vmatpush.msra.mxu3 %v1675_v11  ;;  %v1625_v11 = vld [vmem:[%s2278_s12 + $0xc8] sm:$0xff] }
 0xb96   : > { %1211 = vmatpush.msra.mxu3 %v1676_v12  ;;  %v1624_v12 = vld [vmem:[%s2278_s12 + $0xc0] sm:$0xff] }
 0xb98   : > { %1372 = vmatpush.msrb.mxu3 %v1631_v54 }
 0xb9a   : > { %1373 = vmatpush.msrb.mxu3 %v1630_v55 }
 0xbea   : > { %v1154_v13 = vpop.xlane.xlu1 %1153 }
 0xbeb   : > { %1729 = vrcp.f32 %v1154_v13  ;;  %v1623_v13 = vld [vmem:[%s2278_s12 + $0xb8] sm:$0xff] }
 0xbf1   : > { %v1730_v14 = vpop.eup %1729 }
 0xbf2   : > { %v1168_v15 = vmul.f32 %v1730_v14, %v1722_v56  ;;  %v1157_v16 = vpop.xlane.xlu1 %1156  ;;  %v1629_v56 = vld [vmem:[%s2278_s12 + $0xe8] sm:$0xff]  ;;  %v1622_v14 = vld [vmem:[%s2278_s12 + $0xb0] sm:$0xff] }
 0xbf3   : > { %1731 = vrcp.f32 %v1157_v16  ;;  %1374 = vmatpush.msrb.mxu3 %v1629_v56  ;;  %v1620_v16 = vld [vmem:[%s2278_s12 + $0xa0] sm:$0xff] }
 0xbf4   : > { %1598 = vmatmul.msk.f32.vlgmr.msra.gmra.mxu3 %vm598_vm0, %v1168_v15  ;;  %v1621_v15 = vld [vmem:[%s2278_s12 + $0xa8] sm:$0xff] }
 0xbf5   : > { %1375 = vmatpush.msrb.mxu3 %v1628_v59 }
 0xbf7   : > { %1376 = vmatpush.msrb.mxu3 %v1627_v9 }
 0xbf9   : > { %v1732_v17 = vpop.eup %1731  ;;  %1377 = vmatpush.msrb.mxu3 %v1626_v10 }
 0xbfa   : > { %v1160_v18 = vpop.xlane.xlu1 %1159  ;;  %v1169_v19 = vmul.f32 %v1732_v17, %v1724_v61  ;;  %v1619_v17 = vld [vmem:[%s2278_s12 + $0x98] sm:$0xff] }
 0xbfb   : > { %1733 = vrcp.f32 %v1160_v18  ;;  %1378 = vmatpush.msrb.mxu3 %v1625_v11  ;;  %v1618_v18 = vld [vmem:[%s2278_s12 + $0x90] sm:$0xff] }
 0xbfc   : > { %1599 = vmatmul.msk.f32.gmra.mxu3 %vm598_vm0, %v1169_v19  ;;  %v1617_v19 = vld [vmem:[%s2278_s12 + $0x88] sm:$0xff] }
 0xbfd   : > { %1379 = vmatpush.msrb.mxu3 %v1624_v12 }
 0xbff   : > { %1380 = vmatpush.msrb.mxu3 %v1623_v13 }
 0xc01   : > { %v1734_v20 = vpop.eup %1733  ;;  %1381 = vmatpush.msrb.mxu3 %v1622_v14 }
 0xc02   : > { %v1163_v22 = vpop.xlane.xlu0 %1162  ;;  %v1170_v23 = vmul.f32 %v1734_v20, %v1726_v2  ;;  %v1616_v20 = vld [vmem:[%s2278_s12 + $0x80] sm:$0xff] }
 0xc03   : > { %1735 = vrcp.f32 %v1163_v22  ;;  %1382 = vmatpush.msrb.mxu3 %v1621_v15  ;;  %v1691_v22 = vld [vmem:[%s2277_s11 + $0x1] ss:$0 sm:$0xff] }
 0xc04   : > { %1600 = vmatmul.msk.f32.gmra.mxu3 %vm598_vm0, %v1170_v23 }
 0xc05   : > { %1383 = vmatpush.msrb.mxu3 %v1620_v16 }
 0xc07   : > { %1384 = vmatpush.msrb.mxu3 %v1619_v17 }
 0xc09   : > { %v1736_v24 = vpop.eup %1735  ;;  %1385 = vmatpush.msrb.mxu3 %v1618_v18 }
 0xc0a   : > { %v1171_v25 = vmul.f32 %v1736_v24, %v1728_v5 }
 0xc0b   : > { %1386 = vmatpush.msrb.mxu3 %v1617_v19 }
 0xc0c   : > { %1601 = vmatmul.msk.f32.gmra.mxu3 %vm598_vm0, %v1171_v25 }
 0xc0d   : > { %1387 = vmatpush.msrb.mxu3 %v1616_v20 }
 0xc77   : > { %v1213_v28 = vpop.f32.mrf.mxu3 }
 0xc7f   : > { %v1216_v29 = vpop.f32.mrf.mxu3 }
 0xc80   : > { %1226 = vrot.lane.b32.xlu1 %v1216_v29, %s2300_s0 }
 0xc87   : > { %v1219_v30 = vpop.f32.mrf.mxu3 }
 0xc88   : > { %1230 = vrot.lane.b32.xlu2 %v1219_v30, %s2301_s24  ;;  %s1568_s24 = sshll.u32 %s2304_s28, 1 }
 0xc89   : > { %s590_s25 = scalar_lea.vmem %s2284_s18, %s1568_s24 }
 0xc8f   : > { %v1222_v31 = vpop.f32.mrf.mxu3 }
 0xc90   : > { %1234 = vrot.lane.b32.xlu2 %v1222_v31, %s2302_s21 }
 0xce2   : > { %v1231_v35 = vpop.permute.xlu2 %1230 }
 0xcea   : > { %v1235_v38 = vpop.permute.xlu2 %1234 }
 0xcf2   : > { %v1227_v36 = vpop.permute.xlu1 %1226 }
 0xcf3   : > { %v1237_v37 = vsel %vm682_vm5, %v1213_v28, %v1227_v36  ;;  %vm1487_vm5 = vcmask 1040384  }
 0xcf4   : > { %v1238_v39 = vsel %vm846_vm6, %v1237_v37, %v1231_v35  ;;  %v1692_v35 = vld [vmem:[%s2279_s13 + $0x1] ss:$0 sm:$0xff] }
 0xcf5   : > { %v1239_v40 = vsel %vm848_vm7, %v1238_v39, %v1235_v38 }
 0xcf6   : > { %1607 = vmatmul.msk.f32.vlgmr.msrb.gmra.mxu1 %vm598_vm0, %v1239_v40 }
 0xd73   : > { %v1270_v42 = vpop.f32.mrf.mxu1 }
 0xd74   : > { %v1271_v43 = vadd.f32 %v1688_v41, %v1270_v42 }
 0xd76   : > { %v1273_v45 = vadd.f32 %v1271_v43, %v2080_v21  ;;  %v1612_v21 = vld [vmem:[%s2276_s10 + $0x30] sm:$0xff] }
 0xd77   : > { %1334 = vmatpush.msra.mxu2 %v1612_v21  ;;  %v1427_v21 = vld [vmem:[%s2282_s16] sm:$0xff] }
 0xd78   : > { %v1278_v46 = vsel %vm598_vm0, %v1273_v45, 0.0 }
 0xd79   : > { %1279 = vadd.xlane.f32.xlu2 %v1278_v46  ;;  %1335 = vmatpush.msra.mxu2 %v1611_v52  ;;  %v1434_v46 = vld [vmem:[%s2282_s16 + $0x38] sm:$0xff] }
 0xd7b   : > { %1336 = vmatpush.msra.mxu2 %v1610_v53 }
 0xd7d   : > { %1476 = vmatpush.msrb.mxu2 %v1434_v46 }
 0xdec   : > { %v1280_v47 = vpop.xlane.xlu2 %1279 }
 0xded   : > { %v1281_v44 = vmul.f32 %v1280_v47, %v1870_v8  ;;  %v1433_v47 = vld [vmem:[%s2282_s16 + $0x30] sm:$0xff] }
 0xdee   : > { %1456 = vmatpush.msra.mxu1 %v1433_v47 }
 0xdef   : > { %v1282_v48 = vsub.f32 %v1273_v45, %v1281_v44  ;;  %v1432_v44 = vld [vmem:[%s2282_s16 + $0x28] sm:$0xff] }
 0xdf0   : > { %1477 = vmatpush.msrb.mxu2 %v1432_v44 }
 0xdf1   : > { %v1283_v50 = vmul.f32 %v1282_v48, %v1282_v48 }
 0xdf3   : > { %v1284_v49 = vsel %vm598_vm0, %v1283_v50, 0.0  ;;  %v1430_v50 = vld [vmem:[%s2282_s16 + $0x18] sm:$0xff] }
 0xdf4   : > { %1285 = vadd.xlane.f32.xlu1 %v1284_v49  ;;  %v1429_v49 = vld [vmem:[%s2282_s16 + $0x10] sm:$0xff]  ;;  %1478 = vmatpush.msrb.mxu2 %v1430_v50 }
 0xdf6   : > { %1479 = vmatpush.msrb.mxu2 %v1428_v51 }
 0xe67   : > { %v1286_v57 = vpop.xlane.xlu1 %1285 }
 0xe68   : > { %v1287_v58 = vmul.f32 %v1286_v57, %v1870_v8 }
 0xe6a   : > { %v1288_v60 = vadd.f32 1e-12, %v1287_v58 }
 0xe6c   : > { %1737 = vrsqrt.f32 %v1288_v60  ;;  %vm1295_vm15 = vweird.f32 %v1288_v60 }
 0xe72   : > { %v1738_v61 = vpop.eup %1737 }
 0xe73   : > { %v1290_v62 = vmul.f32 %v1738_v61, %v1288_v60  ;;  %vm1296_vm14 = vweird.f32 %v1738_v61 }
 0xe74   : > { %vm1297_vm1 = vmor %vm1295_vm15, %vm1296_vm14 }
 0xe75   : > { %v1291_v63 = vmul.f32 %v1738_v61, %v1290_v62 }
 0xe77   : > { %v1292_v0 = vmul.f32 0.5, %v1291_v63 }
 0xe79   : > { %v1293_v1 = vsub.f32 1.5, %v1292_v0 }
 0xe7b   : > { %v1294_v2 = vmul.f32 %v1738_v61, %v1293_v1 }
 0xe7d   : > { %v1298_v4 = vsel %vm1297_vm1, %v1738_v61, %v1294_v2  ;;  %v1693_v61 = vld [vmem:[%s2280_s14 + $0x1] ss:$0 sm:$0xff] }
 0xe7e   : > { %v1299_v5 = vmul.f32 %v1298_v4, %v1282_v48  ;;  %v1431_v48 = vld [vmem:[%s2282_s16 + $0x20] sm:$0xff] }
 0xe7f   : > { %1457 = vmatpush.msra.mxu1 %v1431_v48  ;;  %v1435_v2 = vld [vmem:[%s2283_s17] sm:$0x3] }
 0xe80   : > { %v1303_v6 = vmul.f32 %v1689_v3, %v1299_v5  ;;  %v1438_v3 = vperm.slane %v1435_v2, 1  ;;  %v1437_v4 = vperm.slane %v1435_v2, 0  ;;  %v1490_v5 = vlaneseq }
 0xe81   : > { %1458 = vmatpush.msra.mxu1 %v1429_v49 }
 0xe82   : > { %v1307_v7 = vadd.f32 %v1690_v32, %v1303_v6  ;;  %vm1492_vm6 = vcmp.lt.s32.totalorder %v1490_v5, 256 }
 0xe83   : > { %1459 = vmatpush.msra.mxu1 %v1427_v21 }
 0xe84   : > { %1615 = vmatmul.msk.f32.vlgmr.msra.gmra.mxu2 %vm598_vm0, %v1307_v7 }
 0xf07   : > { %v1338_v23 = vpop.f32.mrf.mxu2 }
 0xf08   : > { %v1339_v24 = vadd.f32 %v1691_v22, %v1338_v23 }
 0xf0a   : > { %v1342_v25 = vmul.f32 0.044715, %v1339_v24  ;;  %v1341_v31 = vmul.f32 0.5, %v1339_v24 }
 0xf0c   : > { %v1343_v26 = vmul.f32 %v1342_v25, %v1339_v24 }
 0xf0e   : > { %v1344_v27 = vmul.f32 %v1343_v26, %v1339_v24 }
 0xf10   : > { %v1345_v28 = vadd.f32 %v1344_v27, %v1339_v24 }
 0xf12   : > { %v1346_v29 = vmul.f32 0.7978846, %v1345_v28 }
 0xf14   : > { %1739 = vtanh.f32 %v1346_v29 }
 0xf1a   : > { %v1740_v30 = vpop.eup %1739 }
 0xf1b   : > { %v1348_v33 = vadd.f32 1.0, %v1740_v30 }
 0xf1d   : > { %v1349_v34 = vmul.f32 %v1348_v33, %v1341_v31 }
 0xf1f   : > { %1388 = vmatmul.f32.vlgmr.msrb.gmra.mxu3 %v1349_v34 }
 0xfa2   : > { %v1389_v36 = vpop.f32.mrf.mxu3 }
 0xfa3   : > { %v1390_v37 = vadd.f32 %v1692_v35, %v1389_v36 }
 0xfa5   : > { %v1392_v38 = vadd.f32 %v1390_v37, %v1307_v7 }
 0xfa7   : > { %v1397_v39 = vsel %vm598_vm0, %v1392_v38, 0.0 }
 0xfa8   : > { %1398 = vadd.xlane.f32.xlu0 %v1397_v39 }
0x101b   : > { %v1399_v40 = vpop.xlane.xlu0 %1398 }
0x101c   : > { %v1400_v41 = vmul.f32 %v1399_v40, %v1870_v8 }
0x101e   : > { %v1401_v42 = vsub.f32 %v1392_v38, %v1400_v41 }
0x1020   : > { %v1402_v43 = vmul.f32 %v1401_v42, %v1401_v42 }
0x1022   : > { %v1403_v45 = vsel %vm598_vm0, %v1402_v43, 0.0 }
0x1023   : > { %1404 = vadd.xlane.f32.xlu0 %v1403_v45 }
0x1096   : > { %v1405_v52 = vpop.xlane.xlu0 %1404 }
0x1097   : > { %v1406_v53 = vmul.f32 %v1405_v52, %v1870_v8  ;;  %v1694_v8 = vld [vmem:[%s2281_s15 + $0x1] ss:$0 sm:$0xff] }
0x1099   : > { %v1407_v54 = vadd.f32 1e-12, %v1406_v53 }
0x109b   : > { %1741 = vrsqrt.f32 %v1407_v54  ;;  %vm1414_vm3 = vweird.f32 %v1407_v54 }
0x10a1   : > { %v1742_v55 = vpop.eup %1741 }
0x10a2   : > { %v1409_v56 = vmul.f32 %v1742_v55, %v1407_v54  ;;  %vm1415_vm2 = vweird.f32 %v1742_v55 }
0x10a3   : > { %vm1416_vm4 = vmor %vm1414_vm3, %vm1415_vm2 }
0x10a4   : > { %v1410_v57 = vmul.f32 %v1742_v55, %v1409_v56 }
0x10a6   : > { %v1411_v58 = vmul.f32 0.5, %v1410_v57 }
0x10a8   : > { %v1412_v59 = vsub.f32 1.5, %v1411_v58 }
0x10aa   : > { %v1413_v60 = vmul.f32 %v1742_v55, %v1412_v59 }
0x10ac   : > { %v1417_v62 = vsel %vm1416_vm4, %v1742_v55, %v1413_v60 }
0x10ad   : > { %v1418_v63 = vmul.f32 %v1417_v62, %v1401_v42 }
0x10af   : > { %v1422_v0 = vmul.f32 %v1693_v61, %v1418_v63 }
0x10b1   : > { %v1426_v1 = vadd.f32 %v1694_v8, %v1422_v0 }
0x10b3   : > { %1635 = vmatmul.msk.f32.vlgmr.msra.gmra.mxu1 %vm598_vm0, %v1426_v1  ;;  %1636 = vmatmul.msk.f32.vlgmr.msrb.gmra.mxu2 %vm598_vm0, %v1426_v1 }
0x1130   : > { %v1461_v32 = vpop.f32.mrf.mxu1 }
0x1131   : > { %v1462_v9 = vadd.f32 %v1461_v32, %v1437_v4 }
0x1136   : > { %v1481_v6 = vpop.f32.mrf.mxu2 }
0x1137   : > { %v1482_v7 = vadd.f32 %v1481_v6, %v1438_v3 }
0x1139   : > { %v1486_v10 = vrot.slane %v1482_v7, 7 }
0x113b   : > { %v1488_v11 = vsel %vm1487_vm5, %v1462_v9, %v1486_v10 }
0x113c   : > { %1494 = vst.msk [vmem:[%s590_s25] sm:$0x3] %vm1492_vm6, %v1488_v11 }
0x113d PF: > { %s28_s27 = sadd.s32 1, %s1749_s27  }
0x113e   : > { %p25_p4 = scmp.ge.s32.totalorder %s28_s27, 4  }
0x1140   :  { %27 = sbr.rel (!%p25_p4) target bundleno = 4 (0x4), region = 137 }

</bundles_post_ra>
